<compile_context>
chip_gen: v6e
topology: v6e:2x2x1
jax: 0.10.0
libtpu: 0.0.40
codegen_flags: <defaults>
</compile_context>

<pallas_src>
import functools

import jax
import jax.numpy as jnp
from jax.experimental import pallas as pl
from jax.experimental.pallas import tpu as pltpu


# ----------------------------------------------------------------------------- kernel

def _gru_encoder_kernel(x_ref,      # (U, Hp)   bf16 embedded-token chunk (streamed)
                        h0_ref,     # (1, Hp)   f32 initial hidden state (resident)
                        wih_ref,    # (Hp, 3Hp) bf16 W_ih^T, gate-per-128-lane chunk (resident)
                        whh_ref,    # (Hp, 3Hp) bf16 W_hh^T (resident)
                        bi_ref,     # (1, 3Hp)  f32 [b_ih_r+b_hh_r, b_ih_z+b_hh_z, b_ih_n] (resident)
                        bhn_ref,    # (1, Hp)   f32 b_hh_n (resident)
                        out_ref,    # (U, Hp)   f32 per-step hidden states for this chunk
                        h_scr,      # VMEM (1, Hp) f32: hidden state carried across grid steps
                        *, U, Hp, T):
    c = pl.program_id(0)

    @pl.when(c == 0)
    def _():
        h_scr[...] = h0_ref[...]

    # ---- Phase A: input projection for all U timesteps of this chunk at once.
    # One well-shaped M=U MXU matmul; removes W_ih and the x cast from the serial path.
    gi = jnp.dot(x_ref[...], wih_ref[...],
                 preferred_element_type=jnp.float32) + bi_ref[...]        # (U, 3Hp) f32

    # ---- Phase B: serial GRU recurrence (fully unrolled); only W_hh on the critical path.
    whh = whh_ref[...]
    bhn = bhn_ref[...]
    h = h_scr[...]                                                        # (1, Hp) f32
    base = c * U

    rows = []
    for u in range(U):
        gh = jnp.dot(h.astype(jnp.bfloat16), whh,
                     preferred_element_type=jnp.float32)                  # (1, 3Hp) f32
        gi_u = gi[u:u + 1, :]                                             # (1, 3Hp) static slice
        r = jax.nn.sigmoid(gi_u[:, 0 * Hp:1 * Hp] + gh[:, 0 * Hp:1 * Hp])
        z = jax.nn.sigmoid(gi_u[:, 1 * Hp:2 * Hp] + gh[:, 1 * Hp:2 * Hp])
        n = jnp.tanh(gi_u[:, 2 * Hp:3 * Hp] + r * (gh[:, 2 * Hp:3 * Hp] + bhn))
        h_new = (1.0 - z) * n + z * h                                     # padded lanes stay 0
        if T % U != 0:
            # Tail chunk: padded timesteps must not advance the hidden state.
            h_new = jnp.where(base + u < T, h_new, h)
        rows.append(h_new)
        h = h_new

    h_scr[...] = h
    # One dense (U, Hp) slab store per grid step (no per-row masked partial stores).
    out_ref[...] = jnp.concatenate(rows, axis=0) if len(rows) > 1 else rows[0]


# ----------------------------------------------------------------------------- wrapper

def encoder_forward_sequence(tokens, hidden0, kparams):
    """Encode a whole token sequence with a single pallas_call.

    tokens:  (T,) int32 token ids
    hidden0: (1, 1, H) float32 initial hidden state
    returns: (outputs (T, 1, H), final_hidden (1, 1, H)) -- identical to calling the
             PyTorch Encoder.forward T times in a loop.
    """
    T = int(tokens.shape[0])
    H, Hp = kparams["h"], kparams["hp"]

    U = 8 if T >= 8 else T                    # timesteps fused per grid step
    n_chunks = -(-T // U)
    T_pad = n_chunks * U

    # Embedding lookup (nn.Embedding): plain XLA gather in the wrapper; a per-chunk
    # multi-row data-dependent gather has no clean BlockSpec equivalent.
    x = jnp.take(kparams["emb"], tokens.astype(jnp.int32), axis=0)        # (T, Hp) bf16
    if T_pad != T:
        x = jnp.concatenate([x, jnp.zeros((T_pad - T, Hp), x.dtype)], axis=0)

    h0 = jnp.zeros((1, Hp), jnp.float32).at[:, :H].set(hidden0.reshape(1, H))

    grid_spec = pltpu.PrefetchScalarGridSpec(
        num_scalar_prefetch=0,
        grid=(n_chunks,),
        in_specs=[
            # Streamed bf16 embedded-token chunk (pipelined across chunks).
            pl.BlockSpec((U, Hp), lambda c: (c, 0)),
            # Initial hidden + weights + biases: constant index_maps => VMEM-resident,
            # DMA'd once for the whole sequence.
            pl.BlockSpec((1, Hp), lambda c: (0, 0)),
            pl.BlockSpec((Hp, 3 * Hp), lambda c: (0, 0)),
            pl.BlockSpec((Hp, 3 * Hp), lambda c: (0, 0)),
            pl.BlockSpec((1, 3 * Hp), lambda c: (0, 0)),
            pl.BlockSpec((1, Hp), lambda c: (0, 0)),
        ],
        # Output tiled over T: one (U, Hp) slab per grid step, written back as we go.
        out_specs=pl.BlockSpec((U, Hp), lambda c: (c, 0)),
        scratch_shapes=[pltpu.VMEM((1, Hp), jnp.float32)],
    )

    weight_bytes = 2 * Hp * 3 * Hp * 2                      # two bf16 weight matrices
    cost = pl.CostEstimate(
        flops=int(2 * T_pad * 2 * Hp * 3 * Hp),             # input proj + recurrent matmuls
        transcendentals=int(3 * T_pad * Hp),
        bytes_accessed=int(weight_bytes + T_pad * Hp * 2 + T_pad * Hp * 4
                           + (3 * Hp + 2 * Hp) * 4),
    )

    out = pl.pallas_call(
        functools.partial(_gru_encoder_kernel, U=U, Hp=Hp, T=T),
        out_shape=jax.ShapeDtypeStruct((T_pad, Hp), jnp.float32),
        grid_spec=grid_spec,
        compiler_params=pltpu.CompilerParams(
            # Recurrence across chunks -> sequential grid axis (must stay 'arbitrary').
            dimension_semantics=("arbitrary",),
            # Weights are sequence-resident; keep headroom above the v5e 16 MiB default
            # scoped limit.  Scale with the weight footprint for larger Hp.
            vmem_limit_bytes=32 * 1024 * 1024,
        ),
        cost_estimate=cost,
    )(x, h0, kparams["wih_t"], kparams["whh_t"], kparams["b_i"], kparams["b_hn"])

    outputs = out[:T, :H].reshape(T, 1, H)
    final_hidden = outputs[-1].reshape(1, 1, H)
    return outputs, final_hidden


def encoder_forward(token, hidden, kparams):
    """Exact analogue of PyTorch Encoder.forward: one token -> (output, hidden), each (1,1,H)."""
    outs, hid = encoder_forward_sequence(jnp.asarray(token).reshape(1).astype(jnp.int32),
                                         hidden, kparams)
    return outs.reshape(1, 1, -1), hid


# ----------------------------------------------------------------------------- params

def init_params(input_size, hidden_size, seed=0):
    """Deterministic synthetic parameters with nn.Embedding / nn.GRU(H, H) shapes & init."""
    k_emb, k_wih, k_whh, k_bih, k_bhh = jax.random.split(jax.random.PRNGKey(seed), 5)
    H = hidden_size
    bound = 1.0 / (float(H) ** 0.5)
    return {
        "embedding": jax.random.normal(k_emb, (input_size, H), jnp.float32),
        "w_ih": jax.random.uniform(k_wih, (3 * H, H), jnp.float32, -bound, bound),
        "w_hh": jax.random.uniform(k_whh, (3 * H, H), jnp.float32, -bound, bound),
        "b_ih": jax.random.uniform(k_bih, (3 * H,), jnp.float32, -bound, bound),
        "b_hh": jax.random.uniform(k_bhh, (3 * H,), jnp.float32, -bound, bound),
    }


def prepare_kernel_params(params):
    """Lay parameters out for the kernel: lane-pad H -> Hp (multiple of 128), transpose
    weights to (Hp, 3Hp) bf16 with one 128-lane chunk per gate, pre-sum r/z biases,
    store the embedding table in bf16 (halves the streamed activation bytes)."""
    V, H = params["embedding"].shape
    Hp = ((H + 127) // 128) * 128

    emb = jnp.zeros((V, Hp), jnp.float32).at[:, :H].set(params["embedding"])
    emb = emb.astype(jnp.bfloat16)

    def pack_w(w):  # (3H, H) -> (Hp, 3Hp) transposed, zero-padded, bf16
        wp = jnp.zeros((Hp, 3 * Hp), jnp.float32)
        for g in range(3):
            wp = wp.at[:H, g * Hp:g * Hp + H].set(w[g * H:(g + 1) * H, :].T)
        return wp.astype(jnp.bfloat16)

    b_ih, b_hh = params["b_ih"], params["b_hh"]
    b_i = jnp.zeros((1, 3 * Hp), jnp.float32)
    b_i = b_i.at[0, 0 * Hp:0 * Hp + H].set(b_ih[0:H] + b_hh[0:H])          # r (pre-summed)
    b_i = b_i.at[0, 1 * Hp:1 * Hp + H].set(b_ih[H:2 * H] + b_hh[H:2 * H])  # z (pre-summed)
    b_i = b_i.at[0, 2 * Hp:2 * Hp + H].set(b_ih[2 * H:3 * H])              # n (input bias only)
    b_hn = jnp.zeros((1, Hp), jnp.float32).at[0, :H].set(b_hh[2 * H:3 * H])

    return {
        "emb": emb,
        "wih_t": pack_w(params["w_ih"]),
        "whh_t": pack_w(params["w_hh"]),
        "b_i": b_i,
        "b_hn": b_hn,
        "h": H,
        "hp": Hp,
    }


# ----------------------------------------------------------------------------- reference

def reference_sequence(tokens, hidden0, params, matmul_dtype=jnp.float32):
    """Pure-JAX reference of calling the PyTorch Encoder.forward once per token.
    matmul_dtype=bfloat16 mirrors the kernel's MXU input precision exactly."""
    H = params["embedding"].shape[1]
    h = hidden0.reshape(1, H)
    w_ih_t = params["w_ih"].T.astype(matmul_dtype)
    w_hh_t = params["w_hh"].T.astype(matmul_dtype)
    outs = []
    for tok in tokens:
        x = params["embedding"][tok].reshape(1, H)
        gi = jnp.dot(x.astype(matmul_dtype), w_ih_t,
                     preferred_element_type=jnp.float32) + params["b_ih"]
        gh = jnp.dot(h.astype(matmul_dtype), w_hh_t,
                     preferred_element_type=jnp.float32) + params["b_hh"]
        r = jax.nn.sigmoid(gi[:, :H] + gh[:, :H])
        z = jax.nn.sigmoid(gi[:, H:2 * H] + gh[:, H:2 * H])
        n = jnp.tanh(gi[:, 2 * H:] + r * gh[:, 2 * H:])
        h = (1.0 - z) * n + z * h
        outs.append(h)
    return jnp.stack(outs).reshape(len(tokens), 1, H), h.reshape(1, 1, H)


# ----------------------------------------------------------------------------- main

if __name__ == "__main__":
    INPUT_SIZE = 64     # vocabulary size
    HIDDEN = 32         # hidden size
    SEQ_LEN = 8         # number of encoder steps fused into one kernel launch

    params = init_params(INPUT_SIZE, HIDDEN, seed=0)
    kparams = prepare_kernel_params(params)

    key = jax.random.PRNGKey(0)
    tokens = jax.random.randint(key, (SEQ_LEN,), 0, INPUT_SIZE, dtype=jnp.int32)
    hidden0 = jnp.zeros((1, 1, HIDDEN), jnp.float32)        # Encoder.initHidden()

    # Full-sequence encode: one pallas_call, whole sequence in a single grid step.
    outs, hid = encoder_forward_sequence(tokens, hidden0, kparams)
    outs, hid = jax.block_until_ready((outs, hid))

    # Single-step call matching the original PyTorch forward signature.
    out1, hid1 = encoder_forward(tokens[:1], hidden0, kparams)
    out1, hid1 = jax.block_until_ready((out1, hid1))

    # References: bf16-matmul-matched (tight) and pure-f32 PyTorch math (loose, bf16-weight error).
    ref_o_bf16, ref_h_bf16 = reference_sequence(tokens, hidden0, params, jnp.bfloat16)
    ref_o_f32, ref_h_f32 = reference_sequence(tokens, hidden0, params, jnp.float32)

    assert outs.shape == (SEQ_LEN, 1, HIDDEN) and hid.shape == (1, 1, HIDDEN)
    assert out1.shape == (1, 1, HIDDEN) and hid1.shape == (1, 1, HIDDEN)
    assert jnp.allclose(outs, ref_o_bf16, atol=2e-3, rtol=2e-3)
    assert jnp.allclose(hid, ref_h_bf16, atol=2e-3, rtol=2e-3)
    assert jnp.allclose(outs, ref_o_f32, atol=5e-2)
    assert jnp.allclose(hid, ref_h_f32, atol=5e-2)
    assert jnp.allclose(out1, ref_o_bf16[:1], atol=2e-3, rtol=2e-3)
    assert jnp.allclose(hid1, ref_o_bf16[0].reshape(1, 1, HIDDEN), atol=2e-3, rtol=2e-3)

    print("KERNEL_OK")
</pallas_src>

<mosaic_0001>
module attributes {stable_mosaic.version = 11 : i64} {
  func.func @_gru_encoder_kernel(%arg0: i32, %arg1: memref<8x128xbf16, #tpu.memory_space<vmem>>, %arg2: memref<1x128xf32, #tpu.memory_space<vmem>>, %arg3: memref<128x384xbf16, #tpu.memory_space<vmem>>, %arg4: memref<128x384xbf16, #tpu.memory_space<vmem>>, %arg5: memref<1x384xf32, #tpu.memory_space<vmem>>, %arg6: memref<1x128xf32, #tpu.memory_space<vmem>>, %arg7: memref<8x128xf32, #tpu.memory_space<vmem>>, %arg8: memref<1x128xf32, #tpu.memory_space<vmem>>) attributes {dimension_semantics = [#tpu.dimension_semantics<arbitrary>], iteration_bounds = array<i64: 1>, scalar_prefetch = 0 : i64, scratch_operands = 1 : i64, tpu.core_type = #tpu.core_type<tc>, window_params = [{transform_indices = @transform_0, window_bounds = array<i64: 8, 128>}, {pipeline_mode = #tpu.pipeline_mode<synchronous>, transform_indices = @transform_1, window_bounds = array<i64: 1, 128>}, {pipeline_mode = #tpu.pipeline_mode<synchronous>, transform_indices = @transform_2, window_bounds = array<i64: 128, 384>}, {pipeline_mode = #tpu.pipeline_mode<synchronous>, transform_indices = @transform_3, window_bounds = array<i64: 128, 384>}, {pipeline_mode = #tpu.pipeline_mode<synchronous>, transform_indices = @transform_4, window_bounds = array<i64: 1, 384>}, {pipeline_mode = #tpu.pipeline_mode<synchronous>, transform_indices = @transform_5, window_bounds = array<i64: 1, 128>}, {transform_indices = @transform_6, window_bounds = array<i64: 8, 128>}]} {
    %c0_i32 = arith.constant 0 : i32
    %0 = arith.cmpi eq, %arg0, %c0_i32 : i32
    %1 = arith.extui %0 : i1 to i32
    %c0_i32_0 = arith.constant 0 : i32
    %2 = arith.cmpi ne, %1, %c0_i32_0 : i32
    scf.if %2 {
      %c0_48 = arith.constant 0 : index
      %c0_49 = arith.constant 0 : index
      %255 = vector.load %arg2[%c0_48, %c0_49] : memref<1x128xf32, #tpu.memory_space<vmem>>, vector<1x128xf32>
      %c0_50 = arith.constant 0 : index
      %c0_51 = arith.constant 0 : index
      %256 = vector.load %arg8[%c0_50, %c0_51] : memref<1x128xf32, #tpu.memory_space<vmem>>, vector<1x128xf32>
      tpu.vector_store %arg8[%c0_50, %c0_51], %255 {strides = array<i32>} : memref<1x128xf32, #tpu.memory_space<vmem>>, vector<1x128xf32>,
    } else {
    }
    %c0 = arith.constant 0 : index
    %c0_1 = arith.constant 0 : index
    %3 = vector.load %arg1[%c0, %c0_1] : memref<8x128xbf16, #tpu.memory_space<vmem>>, vector<8x128xbf16>
    %c0_2 = arith.constant 0 : index
    %c0_3 = arith.constant 0 : index
    %4 = vector.load %arg3[%c0_2, %c0_3] : memref<128x384xbf16, #tpu.memory_space<vmem>>, vector<128x384xbf16>
    %cst = arith.constant dense<0.000000e+00> : vector<8x384xf32>
    %5 = tpu.matmul %3, %4, %cst {dimension_numbers = #tpu.dot_dimension_numbers<[1], [0], [0], [1], [0, 0, 1, 1], [], []>} : vector<8x128xbf16>, vector<128x384xbf16>, vector<8x384xf32> -> vector<8x384xf32>
    %c0_4 = arith.constant 0 : index
    %c0_5 = arith.constant 0 : index
    %6 = vector.load %arg5[%c0_4, %c0_5] : memref<1x384xf32, #tpu.memory_space<vmem>>, vector<1x384xf32>
    %7 = vector.broadcast %6 : vector<1x384xf32> to vector<8x384xf32>
    %8 = arith.addf %5, %7 : vector<8x384xf32>
    %c0_6 = arith.constant 0 : index
    %c0_7 = arith.constant 0 : index
    %9 = vector.load %arg4[%c0_6, %c0_7] : memref<128x384xbf16, #tpu.memory_space<vmem>>, vector<128x384xbf16>
    %c0_8 = arith.constant 0 : index
    %c0_9 = arith.constant 0 : index
    %10 = vector.load %arg6[%c0_8, %c0_9] : memref<1x128xf32, #tpu.memory_space<vmem>>, vector<1x128xf32>
    %c0_10 = arith.constant 0 : index
    %c0_11 = arith.constant 0 : index
    %11 = vector.load %arg8[%c0_10, %c0_11] : memref<1x128xf32, #tpu.memory_space<vmem>>, vector<1x128xf32>
    %12 = arith.truncf %11 : vector<1x128xf32> to vector<1x128xbf16>
    %cst_12 = arith.constant dense<0.000000e+00> : vector<1x384xf32>
    %13 = tpu.matmul %12, %9, %cst_12 {dimension_numbers = #tpu.dot_dimension_numbers<[1], [0], [0], [1], [0, 0, 1, 1], [], []>} : vector<1x128xbf16>, vector<128x384xbf16>, vector<1x384xf32> -> vector<1x384xf32>
    %14 = vector.extract_strided_slice %8 {offsets = [0, 0], sizes = [1, 384], strides = [1, 1]} : vector<8x384xf32> to vector<1x384xf32>
    %15 = vector.extract_strided_slice %14 {offsets = [0, 0], sizes = [1, 128], strides = [1, 1]} : vector<1x384xf32> to vector<1x128xf32>
    %16 = vector.extract_strided_slice %13 {offsets = [0, 0], sizes = [1, 128], strides = [1, 1]} : vector<1x384xf32> to vector<1x128xf32>
    %17 = arith.addf %15, %16 : vector<1x128xf32>
    %18 = arith.negf %17 : vector<1x128xf32>
    %19 = math.exp %18 : vector<1x128xf32>
    %cst_13 = arith.constant 1.000000e+00 : f32
    %20 = vector.broadcast %cst_13 : f32 to vector<1x128xf32>
    %21 = arith.addf %20, %19 : vector<1x128xf32>
    %22 = arith.divf %20, %21 : vector<1x128xf32>
    %23 = vector.extract_strided_slice %14 {offsets = [0, 128], sizes = [1, 128], strides = [1, 1]} : vector<1x384xf32> to vector<1x128xf32>
    %24 = vector.extract_strided_slice %13 {offsets = [0, 128], sizes = [1, 128], strides = [1, 1]} : vector<1x384xf32> to vector<1x128xf32>
    %25 = arith.addf %23, %24 : vector<1x128xf32>
    %26 = arith.negf %25 : vector<1x128xf32>
    %27 = math.exp %26 : vector<1x128xf32>
    %cst_14 = arith.constant 1.000000e+00 : f32
    %28 = vector.broadcast %cst_14 : f32 to vector<1x128xf32>
    %29 = arith.addf %28, %27 : vector<1x128xf32>
    %30 = arith.divf %28, %29 : vector<1x128xf32>
    %31 = vector.extract_strided_slice %14 {offsets = [0, 256], sizes = [1, 128], strides = [1, 1]} : vector<1x384xf32> to vector<1x128xf32>
    %32 = vector.extract_strided_slice %13 {offsets = [0, 256], sizes = [1, 128], strides = [1, 1]} : vector<1x384xf32> to vector<1x128xf32>
    %33 = arith.addf %32, %10 : vector<1x128xf32>
    %34 = arith.mulf %22, %33 : vector<1x128xf32>
    %35 = arith.addf %31, %34 : vector<1x128xf32>
    %36 = math.tanh %35 : vector<1x128xf32>
    %cst_15 = arith.constant 1.000000e+00 : f32
    %37 = vector.broadcast %cst_15 : f32 to vector<1x128xf32>
    %38 = arith.subf %37, %30 : vector<1x128xf32>
    %39 = arith.mulf %38, %36 : vector<1x128xf32>
    %40 = arith.mulf %30, %11 : vector<1x128xf32>
    %41 = arith.addf %39, %40 : vector<1x128xf32>
    %42 = arith.truncf %41 : vector<1x128xf32> to vector<1x128xbf16>
    %cst_16 = arith.constant dense<0.000000e+00> : vector<1x384xf32>
    %43 = tpu.matmul %42, %9, %cst_16 {dimension_numbers = #tpu.dot_dimension_numbers<[1], [0], [0], [1], [0, 0, 1, 1], [], []>} : vector<1x128xbf16>, vector<128x384xbf16>, vector<1x384xf32> -> vector<1x384xf32>
    %44 = vector.extract_strided_slice %8 {offsets = [1, 0], sizes = [1, 384], strides = [1, 1]} : vector<8x384xf32> to vector<1x384xf32>
    %45 = vector.extract_strided_slice %44 {offsets = [0, 0], sizes = [1, 128], strides = [1, 1]} : vector<1x384xf32> to vector<1x128xf32>
    %46 = vector.extract_strided_slice %43 {offsets = [0, 0], sizes = [1, 128], strides = [1, 1]} : vector<1x384xf32> to vector<1x128xf32>
    %47 = arith.addf %45, %46 : vector<1x128xf32>
    %48 = arith.negf %47 : vector<1x128xf32>
    %49 = math.exp %48 : vector<1x128xf32>
    %cst_17 = arith.constant 1.000000e+00 : f32
    %50 = vector.broadcast %cst_17 : f32 to vector<1x128xf32>
    %51 = arith.addf %50, %49 : vector<1x128xf32>
    %52 = arith.divf %50, %51 : vector<1x128xf32>
    %53 = vector.extract_strided_slice %44 {offsets = [0, 128], sizes = [1, 128], strides = [1, 1]} : vector<1x384xf32> to vector<1x128xf32>
    %54 = vector.extract_strided_slice %43 {offsets = [0, 128], sizes = [1, 128], strides = [1, 1]} : vector<1x384xf32> to vector<1x128xf32>
    %55 = arith.addf %53, %54 : vector<1x128xf32>
    %56 = arith.negf %55 : vector<1x128xf32>
    %57 = math.exp %56 : vector<1x128xf32>
    %cst_18 = arith.constant 1.000000e+00 : f32
    %58 = vector.broadcast %cst_18 : f32 to vector<1x128xf32>
    %59 = arith.addf %58, %57 : vector<1x128xf32>
    %60 = arith.divf %58, %59 : vector<1x128xf32>
    %61 = vector.extract_strided_slice %44 {offsets = [0, 256], sizes = [1, 128], strides = [1, 1]} : vector<1x384xf32> to vector<1x128xf32>
    %62 = vector.extract_strided_slice %43 {offsets = [0, 256], sizes = [1, 128], strides = [1, 1]} : vector<1x384xf32> to vector<1x128xf32>
    %63 = arith.addf %62, %10 : vector<1x128xf32>
    %64 = arith.mulf %52, %63 : vector<1x128xf32>
    %65 = arith.addf %61, %64 : vector<1x128xf32>
    %66 = math.tanh %65 : vector<1x128xf32>
    %cst_19 = arith.constant 1.000000e+00 : f32
    %67 = vector.broadcast %cst_19 : f32 to vector<1x128xf32>
    %68 = arith.subf %67, %60 : vector<1x128xf32>
    %69 = arith.mulf %68, %66 : vector<1x128xf32>
    %70 = arith.mulf %60, %41 : vector<1x128xf32>
    %71 = arith.addf %69, %70 : vector<1x128xf32>
    %72 = arith.truncf %71 : vector<1x128xf32> to vector<1x128xbf16>
    %cst_20 = arith.constant dense<0.000000e+00> : vector<1x384xf32>
    %73 = tpu.matmul %72, %9, %cst_20 {dimension_numbers = #tpu.dot_dimension_numbers<[1], [0], [0], [1], [0, 0, 1, 1], [], []>} : vector<1x128xbf16>, vector<128x384xbf16>, vector<1x384xf32> -> vector<1x384xf32>
    %74 = vector.extract_strided_slice %8 {offsets = [2, 0], sizes = [1, 384], strides = [1, 1]} : vector<8x384xf32> to vector<1x384xf32>
    %75 = vector.extract_strided_slice %74 {offsets = [0, 0], sizes = [1, 128], strides = [1, 1]} : vector<1x384xf32> to vector<1x128xf32>
    %76 = vector.extract_strided_slice %73 {offsets = [0, 0], sizes = [1, 128], strides = [1, 1]} : vector<1x384xf32> to vector<1x128xf32>
    %77 = arith.addf %75, %76 : vector<1x128xf32>
    %78 = arith.negf %77 : vector<1x128xf32>
    %79 = math.exp %78 : vector<1x128xf32>
    %cst_21 = arith.constant 1.000000e+00 : f32
    %80 = vector.broadcast %cst_21 : f32 to vector<1x128xf32>
    %81 = arith.addf %80, %79 : vector<1x128xf32>
    %82 = arith.divf %80, %81 : vector<1x128xf32>
    %83 = vector.extract_strided_slice %74 {offsets = [0, 128], sizes = [1, 128], strides = [1, 1]} : vector<1x384xf32> to vector<1x128xf32>
    %84 = vector.extract_strided_slice %73 {offsets = [0, 128], sizes = [1, 128], strides = [1, 1]} : vector<1x384xf32> to vector<1x128xf32>
    %85 = arith.addf %83, %84 : vector<1x128xf32>
    %86 = arith.negf %85 : vector<1x128xf32>
    %87 = math.exp %86 : vector<1x128xf32>
    %cst_22 = arith.constant 1.000000e+00 : f32
    %88 = vector.broadcast %cst_22 : f32 to vector<1x128xf32>
    %89 = arith.addf %88, %87 : vector<1x128xf32>
    %90 = arith.divf %88, %89 : vector<1x128xf32>
    %91 = vector.extract_strided_slice %74 {offsets = [0, 256], sizes = [1, 128], strides = [1, 1]} : vector<1x384xf32> to vector<1x128xf32>
    %92 = vector.extract_strided_slice %73 {offsets = [0, 256], sizes = [1, 128], strides = [1, 1]} : vector<1x384xf32> to vector<1x128xf32>
    %93 = arith.addf %92, %10 : vector<1x128xf32>
    %94 = arith.mulf %82, %93 : vector<1x128xf32>
    %95 = arith.addf %91, %94 : vector<1x128xf32>
    %96 = math.tanh %95 : vector<1x128xf32>
    %cst_23 = arith.constant 1.000000e+00 : f32
    %97 = vector.broadcast %cst_23 : f32 to vector<1x128xf32>
    %98 = arith.subf %97, %90 : vector<1x128xf32>
    %99 = arith.mulf %98, %96 : vector<1x128xf32>
    %100 = arith.mulf %90, %71 : vector<1x128xf32>
    %101 = arith.addf %99, %100 : vector<1x128xf32>
    %102 = arith.truncf %101 : vector<1x128xf32> to vector<1x128xbf16>
    %cst_24 = arith.constant dense<0.000000e+00> : vector<1x384xf32>
    %103 = tpu.matmul %102, %9, %cst_24 {dimension_numbers = #tpu.dot_dimension_numbers<[1], [0], [0], [1], [0, 0, 1, 1], [], []>} : vector<1x128xbf16>, vector<128x384xbf16>, vector<1x384xf32> -> vector<1x384xf32>
    %104 = vector.extract_strided_slice %8 {offsets = [3, 0], sizes = [1, 384], strides = [1, 1]} : vector<8x384xf32> to vector<1x384xf32>
    %105 = vector.extract_strided_slice %104 {offsets = [0, 0], sizes = [1, 128], strides = [1, 1]} : vector<1x384xf32> to vector<1x128xf32>
    %106 = vector.extract_strided_slice %103 {offsets = [0, 0], sizes = [1, 128], strides = [1, 1]} : vector<1x384xf32> to vector<1x128xf32>
    %107 = arith.addf %105, %106 : vector<1x128xf32>
    %108 = arith.negf %107 : vector<1x128xf32>
    %109 = math.exp %108 : vector<1x128xf32>
    %cst_25 = arith.constant 1.000000e+00 : f32
    %110 = vector.broadcast %cst_25 : f32 to vector<1x128xf32>
    %111 = arith.addf %110, %109 : vector<1x128xf32>
    %112 = arith.divf %110, %111 : vector<1x128xf32>
    %113 = vector.extract_strided_slice %104 {offsets = [0, 128], sizes = [1, 128], strides = [1, 1]} : vector<1x384xf32> to vector<1x128xf32>
    %114 = vector.extract_strided_slice %103 {offsets = [0, 128], sizes = [1, 128], strides = [1, 1]} : vector<1x384xf32> to vector<1x128xf32>
    %115 = arith.addf %113, %114 : vector<1x128xf32>
    %116 = arith.negf %115 : vector<1x128xf32>
    %117 = math.exp %116 : vector<1x128xf32>
    %cst_26 = arith.constant 1.000000e+00 : f32
    %118 = vector.broadcast %cst_26 : f32 to vector<1x128xf32>
    %119 = arith.addf %118, %117 : vector<1x128xf32>
    %120 = arith.divf %118, %119 : vector<1x128xf32>
    %121 = vector.extract_strided_slice %104 {offsets = [0, 256], sizes = [1, 128], strides = [1, 1]} : vector<1x384xf32> to vector<1x128xf32>
    %122 = vector.extract_strided_slice %103 {offsets = [0, 256], sizes = [1, 128], strides = [1, 1]} : vector<1x384xf32> to vector<1x128xf32>
    %123 = arith.addf %122, %10 : vector<1x128xf32>
    %124 = arith.mulf %112, %123 : vector<1x128xf32>
    %125 = arith.addf %121, %124 : vector<1x128xf32>
    %126 = math.tanh %125 : vector<1x128xf32>
    %cst_27 = arith.constant 1.000000e+00 : f32
    %127 = vector.broadcast %cst_27 : f32 to vector<1x128xf32>
    %128 = arith.subf %127, %120 : vector<1x128xf32>
    %129 = arith.mulf %128, %126 : vector<1x128xf32>
    %130 = arith.mulf %120, %101 : vector<1x128xf32>
    %131 = arith.addf %129, %130 : vector<1x128xf32>
    %132 = arith.truncf %131 : vector<1x128xf32> to vector<1x128xbf16>
    %cst_28 = arith.constant dense<0.000000e+00> : vector<1x384xf32>
    %133 = tpu.matmul %132, %9, %cst_28 {dimension_numbers = #tpu.dot_dimension_numbers<[1], [0], [0], [1], [0, 0, 1, 1], [], []>} : vector<1x128xbf16>, vector<128x384xbf16>, vector<1x384xf32> -> vector<1x384xf32>
    %134 = vector.extract_strided_slice %8 {offsets = [4, 0], sizes = [1, 384], strides = [1, 1]} : vector<8x384xf32> to vector<1x384xf32>
    %135 = vector.extract_strided_slice %134 {offsets = [0, 0], sizes = [1, 128], strides = [1, 1]} : vector<1x384xf32> to vector<1x128xf32>
    %136 = vector.extract_strided_slice %133 {offsets = [0, 0], sizes = [1, 128], strides = [1, 1]} : vector<1x384xf32> to vector<1x128xf32>
    %137 = arith.addf %135, %136 : vector<1x128xf32>
    %138 = arith.negf %137 : vector<1x128xf32>
    %139 = math.exp %138 : vector<1x128xf32>
    %cst_29 = arith.constant 1.000000e+00 : f32
    %140 = vector.broadcast %cst_29 : f32 to vector<1x128xf32>
    %141 = arith.addf %140, %139 : vector<1x128xf32>
    %142 = arith.divf %140, %141 : vector<1x128xf32>
    %143 = vector.extract_strided_slice %134 {offsets = [0, 128], sizes = [1, 128], strides = [1, 1]} : vector<1x384xf32> to vector<1x128xf32>
    %144 = vector.extract_strided_slice %133 {offsets = [0, 128], sizes = [1, 128], strides = [1, 1]} : vector<1x384xf32> to vector<1x128xf32>
    %145 = arith.addf %143, %144 : vector<1x128xf32>
    %146 = arith.negf %145 : vector<1x128xf32>
    %147 = math.exp %146 : vector<1x128xf32>
    %cst_30 = arith.constant 1.000000e+00 : f32
    %148 = vector.broadcast %cst_30 : f32 to vector<1x128xf32>
    %149 = arith.addf %148, %147 : vector<1x128xf32>
    %150 = arith.divf %148, %149 : vector<1x128xf32>
    %151 = vector.extract_strided_slice %134 {offsets = [0, 256], sizes = [1, 128], strides = [1, 1]} : vector<1x384xf32> to vector<1x128xf32>
    %152 = vector.extract_strided_slice %133 {offsets = [0, 256], sizes = [1, 128], strides = [1, 1]} : vector<1x384xf32> to vector<1x128xf32>
    %153 = arith.addf %152, %10 : vector<1x128xf32>
    %154 = arith.mulf %142, %153 : vector<1x128xf32>
    %155 = arith.addf %151, %154 : vector<1x128xf32>
    %156 = math.tanh %155 : vector<1x128xf32>
    %cst_31 = arith.constant 1.000000e+00 : f32
    %157 = vector.broadcast %cst_31 : f32 to vector<1x128xf32>
    %158 = arith.subf %157, %150 : vector<1x128xf32>
    %159 = arith.mulf %158, %156 : vector<1x128xf32>
    %160 = arith.mulf %150, %131 : vector<1x128xf32>
    %161 = arith.addf %159, %160 : vector<1x128xf32>
    %162 = arith.truncf %161 : vector<1x128xf32> to vector<1x128xbf16>
    %cst_32 = arith.constant dense<0.000000e+00> : vector<1x384xf32>
    %163 = tpu.matmul %162, %9, %cst_32 {dimension_numbers = #tpu.dot_dimension_numbers<[1], [0], [0], [1], [0, 0, 1, 1], [], []>} : vector<1x128xbf16>, vector<128x384xbf16>, vector<1x384xf32> -> vector<1x384xf32>
    %164 = vector.extract_strided_slice %8 {offsets = [5, 0], sizes = [1, 384], strides = [1, 1]} : vector<8x384xf32> to vector<1x384xf32>
    %165 = vector.extract_strided_slice %164 {offsets = [0, 0], sizes = [1, 128], strides = [1, 1]} : vector<1x384xf32> to vector<1x128xf32>
    %166 = vector.extract_strided_slice %163 {offsets = [0, 0], sizes = [1, 128], strides = [1, 1]} : vector<1x384xf32> to vector<1x128xf32>
    %167 = arith.addf %165, %166 : vector<1x128xf32>
    %168 = arith.negf %167 : vector<1x128xf32>
    %169 = math.exp %168 : vector<1x128xf32>
    %cst_33 = arith.constant 1.000000e+00 : f32
    %170 = vector.broadcast %cst_33 : f32 to vector<1x128xf32>
    %171 = arith.addf %170, %169 : vector<1x128xf32>
    %172 = arith.divf %170, %171 : vector<1x128xf32>
    %173 = vector.extract_strided_slice %164 {offsets = [0, 128], sizes = [1, 128], strides = [1, 1]} : vector<1x384xf32> to vector<1x128xf32>
    %174 = vector.extract_strided_slice %163 {offsets = [0, 128], sizes = [1, 128], strides = [1, 1]} : vector<1x384xf32> to vector<1x128xf32>
    %175 = arith.addf %173, %174 : vector<1x128xf32>
    %176 = arith.negf %175 : vector<1x128xf32>
    %177 = math.exp %176 : vector<1x128xf32>
    %cst_34 = arith.constant 1.000000e+00 : f32
    %178 = vector.broadcast %cst_34 : f32 to vector<1x128xf32>
    %179 = arith.addf %178, %177 : vector<1x128xf32>
    %180 = arith.divf %178, %179 : vector<1x128xf32>
    %181 = vector.extract_strided_slice %164 {offsets = [0, 256], sizes = [1, 128], strides = [1, 1]} : vector<1x384xf32> to vector<1x128xf32>
    %182 = vector.extract_strided_slice %163 {offsets = [0, 256], sizes = [1, 128], strides = [1, 1]} : vector<1x384xf32> to vector<1x128xf32>
    %183 = arith.addf %182, %10 : vector<1x128xf32>
    %184 = arith.mulf %172, %183 : vector<1x128xf32>
    %185 = arith.addf %181, %184 : vector<1x128xf32>
    %186 = math.tanh %185 : vector<1x128xf32>
    %cst_35 = arith.constant 1.000000e+00 : f32
    %187 = vector.broadcast %cst_35 : f32 to vector<1x128xf32>
    %188 = arith.subf %187, %180 : vector<1x128xf32>
    %189 = arith.mulf %188, %186 : vector<1x128xf32>
    %190 = arith.mulf %180, %161 : vector<1x128xf32>
    %191 = arith.addf %189, %190 : vector<1x128xf32>
    %192 = arith.truncf %191 : vector<1x128xf32> to vector<1x128xbf16>
    %cst_36 = arith.constant dense<0.000000e+00> : vector<1x384xf32>
    %193 = tpu.matmul %192, %9, %cst_36 {dimension_numbers = #tpu.dot_dimension_numbers<[1], [0], [0], [1], [0, 0, 1, 1], [], []>} : vector<1x128xbf16>, vector<128x384xbf16>, vector<1x384xf32> -> vector<1x384xf32>
    %194 = vector.extract_strided_slice %8 {offsets = [6, 0], sizes = [1, 384], strides = [1, 1]} : vector<8x384xf32> to vector<1x384xf32>
    %195 = vector.extract_strided_slice %194 {offsets = [0, 0], sizes = [1, 128], strides = [1, 1]} : vector<1x384xf32> to vector<1x128xf32>
    %196 = vector.extract_strided_slice %193 {offsets = [0, 0], sizes = [1, 128], strides = [1, 1]} : vector<1x384xf32> to vector<1x128xf32>
    %197 = arith.addf %195, %196 : vector<1x128xf32>
    %198 = arith.negf %197 : vector<1x128xf32>
    %199 = math.exp %198 : vector<1x128xf32>
    %cst_37 = arith.constant 1.000000e+00 : f32
    %200 = vector.broadcast %cst_37 : f32 to vector<1x128xf32>
    %201 = arith.addf %200, %199 : vector<1x128xf32>
    %202 = arith.divf %200, %201 : vector<1x128xf32>
    %203 = vector.extract_strided_slice %194 {offsets = [0, 128], sizes = [1, 128], strides = [1, 1]} : vector<1x384xf32> to vector<1x128xf32>
    %204 = vector.extract_strided_slice %193 {offsets = [0, 128], sizes = [1, 128], strides = [1, 1]} : vector<1x384xf32> to vector<1x128xf32>
    %205 = arith.addf %203, %204 : vector<1x128xf32>
    %206 = arith.negf %205 : vector<1x128xf32>
    %207 = math.exp %206 : vector<1x128xf32>
    %cst_38 = arith.constant 1.000000e+00 : f32
    %208 = vector.broadcast %cst_38 : f32 to vector<1x128xf32>
    %209 = arith.addf %208, %207 : vector<1x128xf32>
    %210 = arith.divf %208, %209 : vector<1x128xf32>
    %211 = vector.extract_strided_slice %194 {offsets = [0, 256], sizes = [1, 128], strides = [1, 1]} : vector<1x384xf32> to vector<1x128xf32>
    %212 = vector.extract_strided_slice %193 {offsets = [0, 256], sizes = [1, 128], strides = [1, 1]} : vector<1x384xf32> to vector<1x128xf32>
    %213 = arith.addf %212, %10 : vector<1x128xf32>
    %214 = arith.mulf %202, %213 : vector<1x128xf32>
    %215 = arith.addf %211, %214 : vector<1x128xf32>
    %216 = math.tanh %215 : vector<1x128xf32>
    %cst_39 = arith.constant 1.000000e+00 : f32
    %217 = vector.broadcast %cst_39 : f32 to vector<1x128xf32>
    %218 = arith.subf %217, %210 : vector<1x128xf32>
    %219 = arith.mulf %218, %216 : vector<1x128xf32>
    %220 = arith.mulf %210, %191 : vector<1x128xf32>
    %221 = arith.addf %219, %220 : vector<1x128xf32>
    %222 = arith.truncf %221 : vector<1x128xf32> to vector<1x128xbf16>
    %cst_40 = arith.constant dense<0.000000e+00> : vector<1x384xf32>
    %223 = tpu.matmul %222, %9, %cst_40 {dimension_numbers = #tpu.dot_dimension_numbers<[1], [0], [0], [1], [0, 0, 1, 1], [], []>} : vector<1x128xbf16>, vector<128x384xbf16>, vector<1x384xf32> -> vector<1x384xf32>
    %224 = vector.extract_strided_slice %8 {offsets = [7, 0], sizes = [1, 384], strides = [1, 1]} : vector<8x384xf32> to vector<1x384xf32>
    %225 = vector.extract_strided_slice %224 {offsets = [0, 0], sizes = [1, 128], strides = [1, 1]} : vector<1x384xf32> to vector<1x128xf32>
    %226 = vector.extract_strided_slice %223 {offsets = [0, 0], sizes = [1, 128], strides = [1, 1]} : vector<1x384xf32> to vector<1x128xf32>
    %227 = arith.addf %225, %226 : vector<1x128xf32>
    %228 = arith.negf %227 : vector<1x128xf32>
    %229 = math.exp %228 : vector<1x128xf32>
    %cst_41 = arith.constant 1.000000e+00 : f32
    %230 = vector.broadcast %cst_41 : f32 to vector<1x128xf32>
    %231 = arith.addf %230, %229 : vector<1x128xf32>
    %232 = arith.divf %230, %231 : vector<1x128xf32>
    %233 = vector.extract_strided_slice %224 {offsets = [0, 128], sizes = [1, 128], strides = [1, 1]} : vector<1x384xf32> to vector<1x128xf32>
    %234 = vector.extract_strided_slice %223 {offsets = [0, 128], sizes = [1, 128], strides = [1, 1]} : vector<1x384xf32> to vector<1x128xf32>
    %235 = arith.addf %233, %234 : vector<1x128xf32>
    %236 = arith.negf %235 : vector<1x128xf32>
    %237 = math.exp %236 : vector<1x128xf32>
    %cst_42 = arith.constant 1.000000e+00 : f32
    %238 = vector.broadcast %cst_42 : f32 to vector<1x128xf32>
    %239 = arith.addf %238, %237 : vector<1x128xf32>
    %240 = arith.divf %238, %239 : vector<1x128xf32>
    %241 = vector.extract_strided_slice %224 {offsets = [0, 256], sizes = [1, 128], strides = [1, 1]} : vector<1x384xf32> to vector<1x128xf32>
    %242 = vector.extract_strided_slice %223 {offsets = [0, 256], sizes = [1, 128], strides = [1, 1]} : vector<1x384xf32> to vector<1x128xf32>
    %243 = arith.addf %242, %10 : vector<1x128xf32>
    %244 = arith.mulf %232, %243 : vector<1x128xf32>
    %245 = arith.addf %241, %244 : vector<1x128xf32>
    %246 = math.tanh %245 : vector<1x128xf32>
    %cst_43 = arith.constant 1.000000e+00 : f32
    %247 = vector.broadcast %cst_43 : f32 to vector<1x128xf32>
    %248 = arith.subf %247, %240 : vector<1x128xf32>
    %249 = arith.mulf %248, %246 : vector<1x128xf32>
    %250 = arith.mulf %240, %221 : vector<1x128xf32>
    %251 = arith.addf %249, %250 : vector<1x128xf32>
    %c0_44 = arith.constant 0 : index
    %c0_45 = arith.constant 0 : index
    %252 = vector.load %arg8[%c0_44, %c0_45] : memref<1x128xf32, #tpu.memory_space<vmem>>, vector<1x128xf32>
    tpu.vector_store %arg8[%c0_44, %c0_45], %251 {strides = array<i32>} : memref<1x128xf32, #tpu.memory_space<vmem>>, vector<1x128xf32>,
    %253 = tpu.concatenate %41, %71, %101, %131, %161, %191, %221, %251 in 0 : vector<1x128xf32>, vector<1x128xf32>, vector<1x128xf32>, vector<1x128xf32>, vector<1x128xf32>, vector<1x128xf32>, vector<1x128xf32>, vector<1x128xf32> -> vector<8x128xf32>
    %c0_46 = arith.constant 0 : index
    %c0_47 = arith.constant 0 : index
    %254 = vector.load %arg7[%c0_46, %c0_47] : memref<8x128xf32, #tpu.memory_space<vmem>>, vector<8x128xf32>
    tpu.vector_store %arg7[%c0_46, %c0_47], %253 {strides = array<i32>} : memref<8x128xf32, #tpu.memory_space<vmem>>, vector<8x128xf32>,
    return
  }
  func.func @transform_0(%arg0: i32) -> (i32, i32) {
    %c0_i32 = arith.constant 0 : i32
    %c0_i32_0 = arith.constant 0 : i32
    return %arg0, %c0_i32 : i32, i32
  }
  func.func @transform_1(%arg0: i32) -> (i32, i32) {
    %c0_i32 = arith.constant 0 : i32
    %c0_i32_0 = arith.constant 0 : i32
    %c0_i32_1 = arith.constant 0 : i32
    return %c0_i32, %c0_i32_0 : i32, i32
  }
  func.func @transform_2(%arg0: i32) -> (i32, i32) {
    %c0_i32 = arith.constant 0 : i32
    %c0_i32_0 = arith.constant 0 : i32
    %c0_i32_1 = arith.constant 0 : i32
    return %c0_i32, %c0_i32_0 : i32, i32
  }
  func.func @transform_3(%arg0: i32) -> (i32, i32) {
    %c0_i32 = arith.constant 0 : i32
    %c0_i32_0 = arith.constant 0 : i32
    %c0_i32_1 = arith.constant 0 : i32
    return %c0_i32, %c0_i32_0 : i32, i32
  }
  func.func @transform_4(%arg0: i32) -> (i32, i32) {
    %c0_i32 = arith.constant 0 : i32
    %c0_i32_0 = arith.constant 0 : i32
    %c0_i32_1 = arith.constant 0 : i32
    return %c0_i32, %c0_i32_0 : i32, i32
  }
  func.func @transform_5(%arg0: i32) -> (i32, i32) {
    %c0_i32 = arith.constant 0 : i32
    %c0_i32_0 = arith.constant 0 : i32
    %c0_i32_1 = arith.constant 0 : i32
    return %c0_i32, %c0_i32_0 : i32, i32
  }
  func.func @transform_6(%arg0: i32) -> (i32, i32) {
    %c0_i32 = arith.constant 0 : i32
    %c0_i32_0 = arith.constant 0 : i32
    return %arg0, %c0_i32 : i32, i32
  }
}

</mosaic_0001>

<bundles_post_ra>
// kernel: tpu_custom_call.1
= control target key start
LH: loop header
LB: loop body
LE: loop exit
PB: predicated region body
PF: predicated region fallthrough
CT: control target
= control target key end

     0   :  { %11 = vsyncpa [#allocation4], 0  ;;  %s2523_s0 = inlined_call_operand.hbm [shape: bf16[8,128], index: 0, kind: input, shape index: {}]   ;;  %s2524_s1 = inlined_call_operand.vmem [shape: f32[1,128], index: 1, kind: input, shape index: {}]   ;;  %s2525_s2 = inlined_call_operand.hbm [shape: bf16[128,384], index: 2, kind: input, shape index: {}]   ;;  %s2526_s3 = inlined_call_operand.hbm [shape: bf16[128,384], index: 3, kind: input, shape index: {}]   ;;  %s2527_s4 = inlined_call_operand.vmem [shape: f32[1,384], index: 4, kind: input, shape index: {}]   ;;  %s2528_s5 = inlined_call_operand.vmem [shape: f32[1,128], index: 5, kind: input, shape index: {}]   ;;  %s2529_s6 = inlined_call_operand.hbm [shape: f32[8,128], index: 6, kind: output, shape index: {}]  }
   0x1   :  { %12 = vsyncpa [#allocation7], 0 }
   0x2   :  { %13 = vsyncpa [#allocation5], 0  ;;  %s2045_s21 = smov [#allocation6]  }
   0x3   :  { %s31_s22 = sshll.u32 %s2045_s21, 4  ;;  %s32_s22 = int_to_ptr.vmem [resolvable:$true] %s31_s22 }
   0x4   :  { %s1967_s23 = scalar_lea.vmem %s32_s22, 3072  ;;  %p1972_p1 = scmp.lt.s32.totalorder %s32_s22, %s32_s22 }
   0x5   :  { %p1968_p0 = scmp.ne.s32.totalorder %s32_s22, %s1967_s23  ;;  %p1973_p2 = scmp.lt.s32.totalorder %s1967_s23, %s1967_s23 }
   0x7   :  { %p1974_p3 = por %p1973_p2, %p1972_p1 }
   0x9   :  { %p1975_p4 = pnand %p1974_p3, %p1968_p0 }
   0xb   :  { %1978 = shalt.err (!%p1975_p4)
}
   0xc   :  { %s2046_s24 = smov 192   ;;  %s2047_s25 = smov 12  }
   0xd   :  { %37 = dma.hbm_to_vmem [thread:$0]  %s2525_s2, 3072, %s32_s22, [#allocation7], %s2046_s24, %s2046_s24, %s2047_s25  }
   0xe   :  { %s2048_s28 = smov [#allocation3]   ;;  %s2049_s30 = smov [#allocation8]  }
   0xf   :  { %s20_s29 = sshll.u32 %s2048_s28, 4  ;;  %s43_s7 = sshll.u32 %s2049_s30, 4  ;;  %s21_s29 = int_to_ptr.vmem [resolvable:$true] %s20_s29  ;;  %s44_s7 = int_to_ptr.vmem [resolvable:$true] %s43_s7 }
  0x10   :  { %s1987_s8 = scalar_lea.vmem %s21_s29, 64  ;;  %p1992_p6 = scmp.lt.s32.totalorder %s21_s29, %s21_s29 }
  0x11   :  { %p1988_p5 = scmp.ne.s32.totalorder %s21_s29, %s1987_s8  ;;  %p1993_p7 = scmp.lt.s32.totalorder %s1987_s8, %s1987_s8 }
  0x13   :  { %p1994_p8 = por %p1993_p7, %p1992_p6 }
  0x15   :  { %p1995_p9 = pnand %p1994_p8, %p1988_p5 }
  0x17   :  { %1998 = shalt.err (!%p1995_p9)
}
  0x18   :  { %23 = dma.hbm_to_vmem [thread:$0]  %s2523_s0, 64, %s21_s29, [#allocation4]  }
  0x19   :  { %s2007_s11 = scalar_lea.vmem %s44_s7, 3072  ;;  %p2012_p11 = scmp.lt.s32.totalorder %s44_s7, %s44_s7 }
  0x1a   :  { %p2008_p10 = scmp.ne.s32.totalorder %s44_s7, %s2007_s11  ;;  %p2013_p12 = scmp.lt.s32.totalorder %s2007_s11, %s2007_s11 }
  0x1c   :  { %p2014_p13 = por %p2013_p12, %p2012_p11 }
  0x1e   :  { %p2015_p0 = pnand %p2014_p13, %p2008_p10 }
  0x20   :  { %2018 = shalt.err (!%p2015_p0)
}
  0x21   :  { %49 = dma.hbm_to_vmem [thread:$0]  %s2526_s3, 3072, %s44_s7, [#allocation7], %s2046_s24, %s2046_s24, %s2047_s25  }
  0x22   :  { %2039 = dma.done.wait [#allocation4], 64  }
  0x23   :  { %2040 = vsyncadd [#allocation4], 4294967232 }
  0x24   :  { %2041 = dma.done.wait [#allocation7], 6144  }
  0x25   :  { %2042 = vsyncadd [#allocation7], 4294961152  ;;  %v2050_v0 = vmov 0.0   ;;  %v2051_v1 = vmov 0   ;;  %vm2052_vm0 = vmmov 0   ;;  %v105_v61 = vlaneseq }
  0x26   :  { %1607 = vmatprep.subr.bf16.mxu1 %v2050_v0  ;;  %280 = vmatprep.mubr.bf16.mxu0 %v2051_v1  ;;  %v1796_v2 = vld [vmem:[#allocation6 + $0xac] ss:$12 sps:$4 sm:$0xff]   ;;  %v1798_v3 = vld [vmem:[#allocation6 + $0xa8] ss:$12 sps:$4 sm:$0xff]   ;;  %v1801_v5 = vld [vmem:[#allocation6 + $0x90] ss:$12 sps:$4 sm:$0xff]  }
  0x27   :  { %1623 = vmatprep.mubr.msk.bf16.mxu1 %vm2052_vm0, %v2050_v0  ;;  %248 = vmatprep.subr.bf16.mxu0 %v1796_v2  ;;  %v1799_v4 = vld [vmem:[#allocation6 + $0x94] ss:$12 sps:$4 sm:$0xff]   ;;  %v1802_v6 = vld [vmem:[#allocation6 + $0x7c] ss:$12 sps:$4 sm:$0xff]   ;;  %v1804_v7 = vld [vmem:[#allocation6 + $0x78] ss:$12 sps:$4 sm:$0xff]  }
  0x28   :  { %249 = vmatpush1.bf16.msra.mxu0 %v1798_v3  ;;  %v1805_v8 = vld [vmem:[#allocation6 + $0x64] ss:$12 sps:$4 sm:$0xff]   ;;  %v1807_v10 = vld [vmem:[#allocation6 + $0x60] ss:$12 sps:$4 sm:$0xff]   ;;  %v1810_v13 = vld [vmem:[#allocation6 + $0x48] ss:$12 sps:$4 sm:$0xff]  }
  0x29   :  { %250 = vmatprep.subr.bf16.mxu0 %v1799_v4  ;;  %v1817_v9 = vld [vmem:[#allocation6 + $0xb0] ss:$12 sps:$4 sm:$0xff]   ;;  %v1808_v11 = vld [vmem:[#allocation6 + $0x4c] ss:$12 sps:$4 sm:$0xff]   ;;  %v1811_v14 = vld [vmem:[#allocation6 + $0x34] ss:$12 sps:$4 sm:$0xff]  }
  0x2a   :  { %1608 = vmatpush3.bf16.msra.mxu1 %v1817_v9  ;;  %v1821_v12 = vld [vmem:[#allocation6 + $0x98] ss:$12 sps:$4 sm:$0xff]   ;;  %v1825_v15 = vld [vmem:[#allocation6 + $0x80] ss:$12 sps:$4 sm:$0xff]   ;;  %v1813_v16 = vld [vmem:[#allocation6 + $0x30] ss:$12 sps:$4 sm:$0xff]  }
  0x2b   :  { %1609 = vmatprep.subr.bf16.mxu1 %v2050_v0  ;;  %v1814_v17 = vld [vmem:[#allocation6 + $0x1c] ss:$12 sps:$4 sm:$0xff]   ;;  %v1816_v19 = vld [vmem:[#allocation6 + $0x18] ss:$12 sps:$4 sm:$0xff]   ;;  %v1820_v22 = vld [vmem:[#allocation6] ss:$12 sps:$4 sm:$0xff]  }
  0x2c   :  { %251 = vmatpush1.bf16.msra.mxu0 %v1801_v5  ;;  %v1829_v18 = vld [vmem:[#allocation6 + $0x68] ss:$12 sps:$4 sm:$0xff]   ;;  %v1818_v20 = vld [vmem:[#allocation6 + $0x4] ss:$12 sps:$4 sm:$0xff]   ;;  %v2106_v23 = vld [vmem:[#allocation8 + $0xac] ss:$12 sps:$4 sm:$0xff]  }
  0x2d   :  { %252 = vmatprep.subr.bf16.mxu0 %v1802_v6  ;;  %v1833_v21 = vld [vmem:[#allocation6 + $0x50] ss:$12 sps:$4 sm:$0xff]   ;;  %v1837_v24 = vld [vmem:[#allocation6 + $0x38] ss:$12 sps:$4 sm:$0xff]   ;;  %v2109_v26 = vld [vmem:[#allocation8 + $0xa8] ss:$12 sps:$4 sm:$0xff]  }
  0x2e   :  { %1610 = vmatpush3.bf16.msra.mxu1 %v1821_v12  ;;  %v70_v25 = vld [vmem:[#allocation3] sm:$0xf]  ;;  %v2111_v27 = vld [vmem:[#allocation8 + $0x94] ss:$12 sps:$4 sm:$0xff]   ;;  %v68_v28 = vld [vmem:[%s2524_s1] sm:$0x1] }
  0x2f   :  { %1611 = vmatprep.subr.bf16.mxu1 %v2050_v0  ;;  %v1841_v29 = vld [vmem:[#allocation6 + $0x20] ss:$12 sps:$4 sm:$0xff]   ;;  %69 = vst [vmem:[#allocation2] sm:$0x1] %v68_v28  ;;  %v2118_v30 = vld [vmem:[#allocation8 + $0x90] ss:$12 sps:$4 sm:$0xff]  }
  0x30   :  { %253 = vmatpush1.bf16.msra.mxu0 %v1804_v7  ;;  %v2121_v31 = vld [vmem:[#allocation8 + $0x7c] ss:$12 sps:$4 sm:$0xff]   ;;  %v2127_v33 = vld [vmem:[#allocation8 + $0x78] ss:$12 sps:$4 sm:$0xff]   ;;  %v2136_v36 = vld [vmem:[#allocation8 + $0x60] ss:$12 sps:$4 sm:$0xff]  }
  0x31   :  { %254 = vmatprep.subr.bf16.mxu0 %v1805_v8  ;;  %v1845_v32 = vld [vmem:[#allocation6 + $0x8] ss:$12 sps:$4 sm:$0xff]   ;;  %v2130_v34 = vld [vmem:[#allocation8 + $0x64] ss:$12 sps:$4 sm:$0xff]   ;;  %v2139_v37 = vld [vmem:[#allocation8 + $0x4c] ss:$12 sps:$4 sm:$0xff]  }
  0x32   :  { %1612 = vmatpush3.bf16.msra.mxu1 %v1825_v15  ;;  %v2132_v35 = vld [vmem:[#allocation8 + $0xb0] ss:$12 sps:$4 sm:$0xff]   ;;  %v2142_v38 = vld [vmem:[#allocation8 + $0x98] ss:$12 sps:$4 sm:$0xff]   ;;  %v2148_v39 = vld [vmem:[#allocation8 + $0x48] ss:$12 sps:$4 sm:$0xff]  }
  0x33   :  { %1613 = vmatprep.subr.bf16.mxu1 %v2050_v0  ;;  %v2151_v40 = vld [vmem:[#allocation8 + $0x34] ss:$12 sps:$4 sm:$0xff]   ;;  %v2158_v42 = vld [vmem:[#allocation8 + $0x30] ss:$12 sps:$4 sm:$0xff]   ;;  %v2168_v45 = vld [vmem:[#allocation8 + $0x18] ss:$12 sps:$4 sm:$0xff]  }
  0x34   :  { %255 = vmatpush1.bf16.msra.mxu0 %v1807_v10  ;;  %v2154_v41 = vld [vmem:[#allocation8 + $0x80] ss:$12 sps:$4 sm:$0xff]   ;;  %v2161_v43 = vld [vmem:[#allocation8 + $0x1c] ss:$12 sps:$4 sm:$0xff]   ;;  %v2171_v46 = vld [vmem:[#allocation8 + $0x4] ss:$12 sps:$4 sm:$0xff]  }
  0x35   :  { %256 = vmatprep.subr.bf16.mxu0 %v1808_v11  ;;  %v2164_v44 = vld [vmem:[#allocation8 + $0x68] ss:$12 sps:$4 sm:$0xff]   ;;  %v2174_v47 = vld [vmem:[#allocation8 + $0x50] ss:$12 sps:$4 sm:$0xff]   ;;  %v2178_v48 = vld [vmem:[#allocation8] ss:$12 sps:$4 sm:$0xff]  }
  0x36   :  { %1614 = vmatpush3.bf16.msra.mxu1 %v1829_v18  ;;  %v2180_v49 = vld [vmem:[#allocation2] sm:$0x1]  ;;  %v2191_v52 = vld [vmem:[#allocation8 + $0x20] ss:$12 sps:$4 sm:$0xff]   ;;  %v2198_v53 = vld [vmem:[#allocation8 + $0x8] ss:$12 sps:$4 sm:$0xff]  }
  0x37   :  { %1615 = vmatprep.subr.bf16.mxu1 %v2050_v0  ;;  %v2184_v50 = vld [vmem:[#allocation8 + $0x38] ss:$12 sps:$4 sm:$0xff]   ;;  %v363_v51 = vpack.c.bf16 %v2180_v49, %v2180_v49  ;;  %v106_v63 = vshrl.u32 %v105_v61, 7  ;;  %vm1431_vm1 = vcmask 1040384   ;;  %vm1433_vm2 = vcmask 1041408  }
  0x38   :  { %257 = vmatpush1.bf16.msra.mxu0 %v1810_v13  ;;  %v103_v3 = vld [vmem:[%s2527_s4] sm:$0x7]  ;;  %vm1435_vm3 = vcmask 1042432   ;;  %vm1437_vm4 = vcmask 1043456   ;;  %vm1439_vm5 = vcmask 1044480   ;;  %vm1441_vm6 = vcmask 1045504  }
  0x39   :  { %258 = vmatprep.subr.bf16.mxu0 %v1811_v14  ;;  %v107_v2 = vsub.s32 0, %v106_v63  ;;  %v111_v5 = vsub.s32 1, %v106_v63  ;;  %v2248_v28 = vld [vmem:[%s2528_s5] sm:$0x1]  ;;  %s2053_s5 = smov [#allocation9]   ;;  %vm1443_vm7 = vcmask 1046528  }
  0x3a   :  { %1616 = vmatpush3.bf16.msra.mxu1 %v1833_v21  ;;  %s1452_s15 = sshll.u32 %s2053_s5, 4  ;;  %s1453_s15 = int_to_ptr.vmem [resolvable:$true] %s1452_s15 }
  0x3b   :  { %1617 = vmatprep.subr.bf16.mxu1 %v2050_v0  ;;  %v108_v4 = vrot.slane %v103_v3, %v107_v2  ;;  %v112_v8 = vrot.slane %v103_v3, %v111_v5  ;;  %s2019_s16 = scalar_lea.vmem %s1453_s15, 128  ;;  %p2024_p2 = scmp.lt.s32.totalorder %s1453_s15, %s1453_s15 }
  0x3c   :  { %259 = vmatpush1.bf16.msra.mxu0 %v1813_v16  ;;  %p2020_p1 = scmp.ne.s32.totalorder %s1453_s15, %s2019_s16  ;;  %p2025_p3 = scmp.lt.s32.totalorder %s2019_s16, %s2019_s16 }
  0x3d   :  { %260 = vmatprep.subr.bf16.mxu0 %v1814_v17 }
  0x3e   :  { %1618 = vmatpush3.bf16.msra.mxu1 %v1837_v24  ;;  %v115_v24 = vsub.s32 2, %v106_v63  ;;  %p2026_p4 = por %p2025_p3, %p2024_p2 }
  0x3f   :  { %1619 = vmatprep.subr.bf16.mxu1 %v2050_v0 }
  0x40   :  { %261 = vmatpush1.bf16.msra.mxu0 %v1816_v19  ;;  %p2027_p5 = pnand %p2026_p4, %p2020_p1 }
  0x41   :  { %262 = vmatprep.subr.bf16.mxu0 %v1818_v20 }
  0x42   :  { %1620 = vmatpush3.bf16.msra.mxu1 %v1841_v29  ;;  %v116_v29 = vrot.slane %v103_v3, %v115_v24 }
  0x43   :  { %1621 = vmatprep.subr.bf16.mxu1 %v2050_v0 }
  0x44   :  { %263 = vmatpush1.bf16.msra.mxu0 %v1820_v22 }
  0x45   :  { %492 = vmatprep.subr.bf16.mxu0 %v2106_v23 }
  0x46   :  { %1622 = vmatpush3.bf16.msra.mxu1 %v1845_v32 }
  0x47   :  { %281 = vmatmul.mubr.bf16.vlgmr.msra.gmra.mxu0 %v70_v25  ;;  %1627 = vmatprep.subr.bf16.mxu1 %v2050_v0 }
  0x48   :  { %493 = vmatpush1.bf16.msra.mxu0 %v2109_v26  ;;  %524 = vmatprep.mubr.bf16.mxu0 %v2051_v1 }
  0x49   :  { %494 = vmatprep.subr.bf16.mxu0 %v2111_v27  ;;  %1624 = vmatmul.mubr.bf16.vlgmr.msra.gmra.mxu1 %v70_v25 }
  0x4a   :  { %1628 = vmatpush3.bf16.msra.mxu1 %v2132_v35  ;;  %1643 = vmatprep.mubr.msk.bf16.mxu1 %vm2052_vm0, %v2050_v0 }
  0x4b   :  { %1629 = vmatprep.subr.bf16.mxu1 %v2050_v0 }
  0x4c   :  { %495 = vmatpush1.bf16.msra.mxu0 %v2118_v30 }
  0x4d   :  { %496 = vmatprep.subr.bf16.mxu0 %v2121_v31 }
  0x4e   :  { %1630 = vmatpush3.bf16.msra.mxu1 %v2142_v38 }
  0x4f   :  { %1631 = vmatprep.subr.bf16.mxu1 %v2050_v0 }
  0x50   :  { %497 = vmatpush1.bf16.msra.mxu0 %v2127_v33 }
  0x51   :  { %498 = vmatprep.subr.bf16.mxu0 %v2130_v34 }
  0x52   :  { %1632 = vmatpush3.bf16.msra.mxu1 %v2154_v41 }
  0x53   :  { %1633 = vmatprep.subr.bf16.mxu1 %v2050_v0 }
  0x54   :  { %499 = vmatpush1.bf16.msra.mxu0 %v2136_v36 }
  0x55   :  { %500 = vmatprep.subr.bf16.mxu0 %v2139_v37 }
  0x56   :  { %1634 = vmatpush3.bf16.msra.mxu1 %v2164_v44 }
  0x57   :  { %1635 = vmatprep.subr.bf16.mxu1 %v2050_v0 }
  0x58   :  { %501 = vmatpush1.bf16.msra.mxu0 %v2148_v39 }
  0x59   :  { %502 = vmatprep.subr.bf16.mxu0 %v2151_v40 }
  0x5a   :  { %1636 = vmatpush3.bf16.msra.mxu1 %v2174_v47 }
  0x5b   :  { %1637 = vmatprep.subr.bf16.mxu1 %v2050_v0 }
  0x5c   :  { %503 = vmatpush1.bf16.msra.mxu0 %v2158_v42 }
  0x5d   :  { %504 = vmatprep.subr.bf16.mxu0 %v2161_v43 }
  0x5e   :  { %1638 = vmatpush3.bf16.msra.mxu1 %v2184_v50 }
  0x5f   :  { %1639 = vmatprep.subr.bf16.mxu1 %v2050_v0 }
  0x60   :  { %505 = vmatpush1.bf16.msra.mxu0 %v2168_v45 }
  0x61   :  { %506 = vmatprep.subr.bf16.mxu0 %v2171_v46 }
  0x62   :  { %1640 = vmatpush3.bf16.msra.mxu1 %v2191_v52 }
  0x63   :  { %1641 = vmatprep.subr.bf16.mxu1 %v2050_v0 }
  0x64   :  { %507 = vmatpush1.bf16.msra.mxu0 %v2178_v48 }
  0x65   :  { %596 = vmatprep.subr.bf16.mxu0 %v2106_v23 }
  0x66   :  { %1642 = vmatpush3.bf16.msra.mxu1 %v2198_v53 }
  0x67   :  { %525 = vmatmul.mubr.bf16.vlgmr.msra.gmra.mxu0 %v363_v51  ;;  %1647 = vmatprep.subr.bf16.mxu1 %v2050_v0 }
  0x68   :  { %597 = vmatpush1.bf16.msra.mxu0 %v2109_v26  ;;  %628 = vmatprep.mubr.bf16.mxu0 %v2051_v1 }
  0x69   :  { %598 = vmatprep.subr.bf16.mxu0 %v2111_v27  ;;  %1644 = vmatmul.mubr.bf16.vlgmr.msra.gmra.mxu1 %v363_v51 }
  0x6a   :  { %1648 = vmatpush3.bf16.msra.mxu1 %v2132_v35  ;;  %1663 = vmatprep.mubr.msk.bf16.mxu1 %vm2052_vm0, %v2050_v0 }
  0x6b   :  { %1649 = vmatprep.subr.bf16.mxu1 %v2050_v0 }
  0x6c   :  { %599 = vmatpush1.bf16.msra.mxu0 %v2118_v30 }
  0x6d   :  { %600 = vmatprep.subr.bf16.mxu0 %v2121_v31 }
  0x6e   :  { %1650 = vmatpush3.bf16.msra.mxu1 %v2142_v38 }
  0x6f   :  { %1651 = vmatprep.subr.bf16.mxu1 %v2050_v0 }
  0x70   :  { %601 = vmatpush1.bf16.msra.mxu0 %v2127_v33 }
  0x71   :  { %602 = vmatprep.subr.bf16.mxu0 %v2130_v34 }
  0x72   :  { %1652 = vmatpush3.bf16.msra.mxu1 %v2154_v41 }
  0x73   :  { %1653 = vmatprep.subr.bf16.mxu1 %v2050_v0 }
  0x74   :  { %603 = vmatpush1.bf16.msra.mxu0 %v2136_v36 }
  0x75   :  { %604 = vmatprep.subr.bf16.mxu0 %v2139_v37 }
  0x76   :  { %1654 = vmatpush3.bf16.msra.mxu1 %v2164_v44 }
  0x77   :  { %1655 = vmatprep.subr.bf16.mxu1 %v2050_v0 }
  0x78   :  { %605 = vmatpush1.bf16.msra.mxu0 %v2148_v39 }
  0x79   :  { %606 = vmatprep.subr.bf16.mxu0 %v2151_v40 }
  0x7a   :  { %1656 = vmatpush3.bf16.msra.mxu1 %v2174_v47 }
  0x7b   :  { %1657 = vmatprep.subr.bf16.mxu1 %v2050_v0 }
  0x7c   :  { %607 = vmatpush1.bf16.msra.mxu0 %v2158_v42 }
  0x7d   :  { %608 = vmatprep.subr.bf16.mxu0 %v2161_v43 }
  0x7e   :  { %1658 = vmatpush3.bf16.msra.mxu1 %v2184_v50 }
  0x7f   :  { %1659 = vmatprep.subr.bf16.mxu1 %v2050_v0 }
  0x80   :  { %609 = vmatpush1.bf16.msra.mxu0 %v2168_v45 }
  0x81   :  { %610 = vmatprep.subr.bf16.mxu0 %v2171_v46 }
  0x82   :  { %1660 = vmatpush3.bf16.msra.mxu1 %v2191_v52 }
  0x83   :  { %1661 = vmatprep.subr.bf16.mxu1 %v2050_v0 }
  0x84   :  { %611 = vmatpush1.bf16.msra.mxu0 %v2178_v48 }
  0x85   :  { %716 = vmatprep.subr.bf16.mxu0 %v2106_v23 }
  0x86   :  { %1662 = vmatpush3.bf16.msra.mxu1 %v2198_v53 }
  0x87   :  { %1667 = vmatprep.subr.bf16.mxu1 %v2050_v0 }
 0x107   :  { %v282_v54 = vpop.f32.mrf.mxu0 }
 0x108   :  { %v2239_v6 = vadd.f32 %v282_v54, %v108_v4 }
 0x109   :  { %v284_v55 = vpop.f32.mrf.mxu0  ;;  %v323_v58 = vpop.f32.mrf.mxu1 }
 0x10a   :  { %v2242_v13 = vadd.f32 %v284_v55, %v112_v8  ;;  %v2251_v55 = vadd.f32 %v323_v58, %v116_v29 }
 0x10b   :  { %v286_v56 = vpop.f32.mrf.mxu0  ;;  %v1625_v59 = vpop.f32.mrf.mxu1 }
 0x10d   :  { %v287_v57 = vpop.f32.mrf.mxu0  ;;  %v326_v60 = vpop.f32.mrf.mxu1 }
 0x10f   :  { %v1626_v62 = vpop.f32.mrf.mxu1 }
 0x127   :  { %v526_v7 = vpop.f32.mrf.mxu0 }
 0x128   :  { %v573_v9 = vadd.f32 %v526_v7, %v2239_v6 }
 0x129   :  { %v528_v10 = vpop.f32.mrf.mxu0  ;;  %v567_v16 = vpop.f32.mrf.mxu1 }
 0x12a   :  { %v1510_v11 = vmul.f32 -1.442695, %v573_v9  ;;  %v580_v15 = vadd.f32 %v528_v10, %v2242_v13  ;;  %v587_v51 = vadd.f32 %v567_v16, %v2248_v28 }
 0x12b   :  { %v530_v12 = vpop.f32.mrf.mxu0  ;;  %v1645_v18 = vpop.f32.mrf.mxu1 }
 0x12c   :  { %1860 = vpow2.f32 %v1510_v11  ;;  %v1511_v17 = vmul.f32 -1.442695, %v580_v15 }
 0x12d   :  { %v531_v14 = vpop.f32.mrf.mxu0  ;;  %v570_v19 = vpop.f32.mrf.mxu1 }
 0x12e   :  { %1862 = vpow2.f32 %v1511_v17 }
 0x12f   :  { %v1646_v20 = vpop.f32.mrf.mxu1 }
 0x139   :  { %v1861_v21 = vpop.eup %1860 }
 0x13a   :  { %v577_v22 = vadd.f32 1.0, %v1861_v21 }
 0x13b   :  { %v1863_v25 = vpop.eup %1862 }
 0x13c   :  { %1864 = vrcp.f32 %v577_v22  ;;  %v584_v32 = vadd.f32 1.0, %v1863_v25 }
 0x13e   :  { %1866 = vrcp.f32 %v584_v32 }
 0x149   :  { %v1865_v54 = vpop.eup %1864 }
 0x14a   :  { %v588_v56 = vmul.f32 %v1865_v54, %v587_v51 }
 0x14b   :  { %v1867_v59 = vpop.eup %1866 }
 0x14c   :  { %v589_v57 = vadd.f32 %v588_v56, %v2251_v55  ;;  %v591_v60 = vsub.f32 1.0, %v1867_v59  ;;  %v593_v63 = vmul.f32 %v1867_v59, %v2180_v49 }
 0x14e   :  { %1868 = vtanh.f32 %v589_v57 }
 0x15b   :  { %v1869_v61 = vpop.eup %1868 }
 0x15c   :  { %v592_v62 = vmul.f32 %v1869_v61, %v591_v60 }
 0x15e   :  { %v2255_v2 = vadd.f32 %v593_v63, %v592_v62 }
 0x160   :  { %v595_v3 = vpack.c.bf16 %v2255_v2, %v2255_v2  ;;  %v707_v56 = vrot.slane %v2255_v2, 7 }
 0x162   :  { %629 = vmatmul.mubr.bf16.vlgmr.msra.gmra.mxu0 %v595_v3  ;;  %1664 = vmatmul.mubr.bf16.vlgmr.msra.gmra.mxu1 %v595_v3 }
 0x163   :  { %717 = vmatpush1.bf16.msra.mxu0 %v2109_v26  ;;  %1668 = vmatpush3.bf16.msra.mxu1 %v2132_v35 }
 0x164   :  { %718 = vmatprep.subr.bf16.mxu0 %v2111_v27  ;;  %1669 = vmatprep.subr.bf16.mxu1 %v2050_v0 }
 0x165   :  { %748 = vmatprep.mubr.bf16.mxu0 %v2051_v1  ;;  %1683 = vmatprep.mubr.msk.bf16.mxu1 %vm2052_vm0, %v2050_v0 }
 0x167   :  { %719 = vmatpush1.bf16.msra.mxu0 %v2118_v30  ;;  %1670 = vmatpush3.bf16.msra.mxu1 %v2142_v38 }
 0x168   :  { %720 = vmatprep.subr.bf16.mxu0 %v2121_v31  ;;  %1671 = vmatprep.subr.bf16.mxu1 %v2050_v0 }
 0x16b   :  { %721 = vmatpush1.bf16.msra.mxu0 %v2127_v33  ;;  %1672 = vmatpush3.bf16.msra.mxu1 %v2154_v41 }
 0x16c   :  { %722 = vmatprep.subr.bf16.mxu0 %v2130_v34  ;;  %1673 = vmatprep.subr.bf16.mxu1 %v2050_v0 }
 0x16f   :  { %723 = vmatpush1.bf16.msra.mxu0 %v2136_v36  ;;  %1674 = vmatpush3.bf16.msra.mxu1 %v2164_v44 }
 0x170   :  { %724 = vmatprep.subr.bf16.mxu0 %v2139_v37  ;;  %1675 = vmatprep.subr.bf16.mxu1 %v2050_v0 }
 0x173   :  { %725 = vmatpush1.bf16.msra.mxu0 %v2148_v39  ;;  %1676 = vmatpush3.bf16.msra.mxu1 %v2174_v47 }
 0x174   :  { %726 = vmatprep.subr.bf16.mxu0 %v2151_v40  ;;  %1677 = vmatprep.subr.bf16.mxu1 %v2050_v0 }
 0x177   :  { %727 = vmatpush1.bf16.msra.mxu0 %v2158_v42  ;;  %1678 = vmatpush3.bf16.msra.mxu1 %v2184_v50 }
 0x178   :  { %728 = vmatprep.subr.bf16.mxu0 %v2161_v43  ;;  %1679 = vmatprep.subr.bf16.mxu1 %v2050_v0 }
 0x17b   :  { %729 = vmatpush1.bf16.msra.mxu0 %v2168_v45  ;;  %1680 = vmatpush3.bf16.msra.mxu1 %v2191_v52 }
 0x17c   :  { %730 = vmatprep.subr.bf16.mxu0 %v2171_v46  ;;  %1681 = vmatprep.subr.bf16.mxu1 %v2050_v0 }
 0x17f   :  { %731 = vmatpush1.bf16.msra.mxu0 %v2178_v48  ;;  %1682 = vmatpush3.bf16.msra.mxu1 %v2198_v53 }
 0x180   :  { %835 = vmatprep.subr.bf16.mxu0 %v2106_v23  ;;  %1687 = vmatprep.subr.bf16.mxu1 %v2050_v0 }
 0x222   :  { %v630_v49 = vpop.f32.mrf.mxu0  ;;  %v671_v58 = vpop.f32.mrf.mxu1 }
 0x223   :  { %v678_v4 = vrot.slane %v630_v49, 7  ;;  %v697_v21 = vadd.f32 %v671_v58, %v2248_v28 }
 0x224   :  { %v632_v5 = vpop.f32.mrf.mxu0  ;;  %v1665_v7 = vpop.f32.mrf.mxu1 }
 0x225   :  { %v680_v8 = vadd.f32 %v678_v4, %v2239_v6  ;;  %v688_v12 = vrot.slane %v632_v5, 7  ;;  %v699_v24 = vrot.slane %v697_v21, 7 }
 0x226   :  { %v634_v9 = vpop.f32.mrf.mxu0  ;;  %v674_v10 = vpop.f32.mrf.mxu1 }
 0x227   :  { %v1512_v11 = vmul.f32 -1.442695, %v680_v8  ;;  %v690_v16 = vadd.f32 %v688_v12, %v2242_v13 }
 0x228   :  { %v635_v14 = vpop.f32.mrf.mxu0  ;;  %v1666_v15 = vpop.f32.mrf.mxu1 }
 0x229   :  { %1870 = vpow2.f32 %v1512_v11  ;;  %v1513_v17 = vmul.f32 -1.442695, %v690_v16 }
 0x22b   :  { %1872 = vpow2.f32 %v1513_v17 }
 0x236   :  { %v1871_v18 = vpop.eup %1870 }
 0x237   :  { %v684_v19 = vadd.f32 1.0, %v1871_v18 }
 0x238   :  { %v1873_v20 = vpop.eup %1872 }
 0x239   :  { %1874 = vrcp.f32 %v684_v19  ;;  %v694_v22 = vadd.f32 1.0, %v1873_v20 }
 0x23b   :  { %1876 = vrcp.f32 %v694_v22 }
 0x246   :  { %v1875_v25 = vpop.eup %1874 }
 0x247   :  { %v701_v29 = vmul.f32 %v1875_v25, %v699_v24 }
 0x248   :  { %v1877_v51 = vpop.eup %1876 }
 0x249   :  { %v702_v32 = vadd.f32 %v701_v29, %v2251_v55  ;;  %v704_v54 = vsub.f32 1.0, %v1877_v51  ;;  %v709_v60 = vmul.f32 %v1877_v51, %v707_v56 }
 0x24b   :  { %1878 = vtanh.f32 %v702_v32 }
 0x258   :  { %v1879_v57 = vpop.eup %1878 }
 0x259   :  { %v705_v59 = vmul.f32 %v1879_v57, %v704_v54 }
 0x25b   :  { %v2299_v61 = vadd.f32 %v709_v60, %v705_v59 }
 0x25d   :  { %v711_v62 = vpack.c.bf16 %v2299_v61, %v2299_v61  ;;  %v827_v54 = vrot.slane %v2299_v61, 7 }
 0x25f   :  { %v713_v63 = vshrl.u32 %v711_v62, 16  ;;  %v1432_v62 = vsel %vm1431_vm1, %v2255_v2, %v2299_v61 }
 0x261   :  { %749 = vmatmul.mubr.bf16.vlgmr.msra.gmra.mxu0 %v713_v63  ;;  %1684 = vmatmul.mubr.bf16.vlgmr.msra.gmra.mxu1 %v713_v63 }
 0x262   :  { %836 = vmatpush1.bf16.msra.mxu0 %v2109_v26  ;;  %1688 = vmatpush3.bf16.msra.mxu1 %v2132_v35 }
 0x263   :  { %837 = vmatprep.subr.bf16.mxu0 %v2111_v27  ;;  %1689 = vmatprep.subr.bf16.mxu1 %v2050_v0 }
 0x264   :  { %867 = vmatprep.mubr.bf16.mxu0 %v2051_v1  ;;  %1703 = vmatprep.mubr.msk.bf16.mxu1 %vm2052_vm0, %v2050_v0 }
 0x266   :  { %838 = vmatpush1.bf16.msra.mxu0 %v2118_v30  ;;  %1690 = vmatpush3.bf16.msra.mxu1 %v2142_v38 }
 0x267   :  { %839 = vmatprep.subr.bf16.mxu0 %v2121_v31  ;;  %1691 = vmatprep.subr.bf16.mxu1 %v2050_v0 }
 0x26a   :  { %840 = vmatpush1.bf16.msra.mxu0 %v2127_v33  ;;  %1692 = vmatpush3.bf16.msra.mxu1 %v2154_v41 }
 0x26b   :  { %841 = vmatprep.subr.bf16.mxu0 %v2130_v34  ;;  %1693 = vmatprep.subr.bf16.mxu1 %v2050_v0 }
 0x26e   :  { %842 = vmatpush1.bf16.msra.mxu0 %v2136_v36  ;;  %1694 = vmatpush3.bf16.msra.mxu1 %v2164_v44 }
 0x26f   :  { %843 = vmatprep.subr.bf16.mxu0 %v2139_v37  ;;  %1695 = vmatprep.subr.bf16.mxu1 %v2050_v0 }
 0x272   :  { %844 = vmatpush1.bf16.msra.mxu0 %v2148_v39  ;;  %1696 = vmatpush3.bf16.msra.mxu1 %v2174_v47 }
 0x273   :  { %845 = vmatprep.subr.bf16.mxu0 %v2151_v40  ;;  %1697 = vmatprep.subr.bf16.mxu1 %v2050_v0 }
 0x276   :  { %846 = vmatpush1.bf16.msra.mxu0 %v2158_v42  ;;  %1698 = vmatpush3.bf16.msra.mxu1 %v2184_v50 }
 0x277   :  { %847 = vmatprep.subr.bf16.mxu0 %v2161_v43  ;;  %1699 = vmatprep.subr.bf16.mxu1 %v2050_v0 }
 0x27a   :  { %848 = vmatpush1.bf16.msra.mxu0 %v2168_v45  ;;  %1700 = vmatpush3.bf16.msra.mxu1 %v2191_v52 }
 0x27b   :  { %849 = vmatprep.subr.bf16.mxu0 %v2171_v46  ;;  %1701 = vmatprep.subr.bf16.mxu1 %v2050_v0 }
 0x27e   :  { %850 = vmatpush1.bf16.msra.mxu0 %v2178_v48  ;;  %1702 = vmatpush3.bf16.msra.mxu1 %v2198_v53 }
 0x27f   :  { %956 = vmatprep.subr.bf16.mxu0 %v2106_v23  ;;  %1707 = vmatprep.subr.bf16.mxu1 %v2050_v0 }
 0x321   :  { %v750_v3 = vpop.f32.mrf.mxu0  ;;  %v791_v49 = vpop.f32.mrf.mxu1 }
 0x322   :  { %v798_v58 = vrot.slane %v750_v3, 6  ;;  %v817_v20 = vadd.f32 %v791_v49, %v2248_v28 }
 0x323   :  { %v752_v4 = vpop.f32.mrf.mxu0  ;;  %v1685_v5 = vpop.f32.mrf.mxu1 }
 0x324   :  { %v800_v7 = vadd.f32 %v798_v58, %v2239_v6  ;;  %v808_v11 = vrot.slane %v752_v4, 6  ;;  %v819_v22 = vrot.slane %v817_v20, 6 }
 0x325   :  { %v754_v8 = vpop.f32.mrf.mxu0  ;;  %v794_v9 = vpop.f32.mrf.mxu1 }
 0x326   :  { %v1514_v10 = vmul.f32 -1.442695, %v800_v7  ;;  %v810_v15 = vadd.f32 %v808_v11, %v2242_v13 }
 0x327   :  { %v755_v12 = vpop.f32.mrf.mxu0  ;;  %v1686_v14 = vpop.f32.mrf.mxu1 }
 0x328   :  { %1880 = vpow2.f32 %v1514_v10  ;;  %v1515_v16 = vmul.f32 -1.442695, %v810_v15 }
 0x32a   :  { %1882 = vpow2.f32 %v1515_v16 }
 0x335   :  { %v1881_v17 = vpop.eup %1880 }
 0x336   :  { %v804_v18 = vadd.f32 1.0, %v1881_v17 }
 0x337   :  { %v1883_v19 = vpop.eup %1882 }
 0x338   :  { %1884 = vrcp.f32 %v804_v18  ;;  %v814_v21 = vadd.f32 1.0, %v1883_v19 }
 0x33a   :  { %1886 = vrcp.f32 %v814_v21 }
 0x345   :  { %v1885_v24 = vpop.eup %1884 }
 0x346   :  { %v821_v25 = vmul.f32 %v1885_v24, %v819_v22 }
 0x347   :  { %v1887_v32 = vpop.eup %1886 }
 0x348   :  { %v822_v29 = vadd.f32 %v821_v25, %v2251_v55  ;;  %v824_v51 = vsub.f32 1.0, %v1887_v32  ;;  %v829_v59 = vmul.f32 %v1887_v32, %v827_v54 }
 0x34a   :  { %1888 = vtanh.f32 %v822_v29 }
 0x357   :  { %v1889_v56 = vpop.eup %1888 }
 0x358   :  { %v825_v57 = vmul.f32 %v1889_v56, %v824_v51 }
 0x35a   :  { %v2343_v60 = vadd.f32 %v829_v59, %v825_v57 }
 0x35c   :  { %v831_v63 = vpack.c.bf16 %v2343_v60, %v2343_v60  ;;  %v2350_v3 = vsel %vm1433_vm2, %v1432_v62, %v2343_v60  ;;  %v946_v54 = vrot.slane %v2343_v60, 7 }
 0x35e   :  { %v833_v49 = vrot.slane %v831_v63, 1 }
 0x360   :  { %868 = vmatmul.mubr.bf16.vlgmr.msra.gmra.mxu0 %v833_v49  ;;  %1704 = vmatmul.mubr.bf16.vlgmr.msra.gmra.mxu1 %v833_v49 }
 0x361   :  { %957 = vmatpush1.bf16.msra.mxu0 %v2109_v26  ;;  %1708 = vmatpush3.bf16.msra.mxu1 %v2132_v35 }
 0x362   :  { %958 = vmatprep.subr.bf16.mxu0 %v2111_v27  ;;  %1709 = vmatprep.subr.bf16.mxu1 %v2050_v0 }
 0x363   :  { %988 = vmatprep.mubr.bf16.mxu0 %v2051_v1  ;;  %1723 = vmatprep.mubr.msk.bf16.mxu1 %vm2052_vm0, %v2050_v0 }
 0x365   :  { %959 = vmatpush1.bf16.msra.mxu0 %v2118_v30  ;;  %1710 = vmatpush3.bf16.msra.mxu1 %v2142_v38 }
 0x366   :  { %960 = vmatprep.subr.bf16.mxu0 %v2121_v31  ;;  %1711 = vmatprep.subr.bf16.mxu1 %v2050_v0 }
 0x369   :  { %961 = vmatpush1.bf16.msra.mxu0 %v2127_v33  ;;  %1712 = vmatpush3.bf16.msra.mxu1 %v2154_v41 }
 0x36a   :  { %962 = vmatprep.subr.bf16.mxu0 %v2130_v34  ;;  %1713 = vmatprep.subr.bf16.mxu1 %v2050_v0 }
 0x36d   :  { %963 = vmatpush1.bf16.msra.mxu0 %v2136_v36  ;;  %1714 = vmatpush3.bf16.msra.mxu1 %v2164_v44 }
 0x36e   :  { %964 = vmatprep.subr.bf16.mxu0 %v2139_v37  ;;  %1715 = vmatprep.subr.bf16.mxu1 %v2050_v0 }
 0x371   :  { %965 = vmatpush1.bf16.msra.mxu0 %v2148_v39  ;;  %1716 = vmatpush3.bf16.msra.mxu1 %v2174_v47 }
 0x372   :  { %966 = vmatprep.subr.bf16.mxu0 %v2151_v40  ;;  %1717 = vmatprep.subr.bf16.mxu1 %v2050_v0 }
 0x375   :  { %967 = vmatpush1.bf16.msra.mxu0 %v2158_v42  ;;  %1718 = vmatpush3.bf16.msra.mxu1 %v2184_v50 }
 0x376   :  { %968 = vmatprep.subr.bf16.mxu0 %v2161_v43  ;;  %1719 = vmatprep.subr.bf16.mxu1 %v2050_v0 }
 0x379   :  { %969 = vmatpush1.bf16.msra.mxu0 %v2168_v45  ;;  %1720 = vmatpush3.bf16.msra.mxu1 %v2191_v52 }
 0x37a   :  { %970 = vmatprep.subr.bf16.mxu0 %v2171_v46  ;;  %1721 = vmatprep.subr.bf16.mxu1 %v2050_v0 }
 0x37d   :  { %971 = vmatpush1.bf16.msra.mxu0 %v2178_v48  ;;  %1722 = vmatpush3.bf16.msra.mxu1 %v2198_v53 }
 0x37e   :  { %1075 = vmatprep.subr.bf16.mxu0 %v2106_v23  ;;  %1727 = vmatprep.subr.bf16.mxu1 %v2050_v0 }
 0x420   :  { %v869_v2 = vpop.f32.mrf.mxu0  ;;  %v910_v61 = vpop.f32.mrf.mxu1 }
 0x421   :  { %v917_v58 = vrot.slane %v869_v2, 5  ;;  %v936_v20 = vadd.f32 %v910_v61, %v2248_v28 }
 0x422   :  { %v871_v4 = vpop.f32.mrf.mxu0  ;;  %v1705_v5 = vpop.f32.mrf.mxu1 }
 0x423   :  { %v919_v7 = vadd.f32 %v917_v58, %v2239_v6  ;;  %v927_v11 = vrot.slane %v871_v4, 5  ;;  %v938_v22 = vrot.slane %v936_v20, 5 }
 0x424   :  { %v873_v8 = vpop.f32.mrf.mxu0  ;;  %v913_v9 = vpop.f32.mrf.mxu1 }
 0x425   :  { %v1516_v10 = vmul.f32 -1.442695, %v919_v7  ;;  %v929_v15 = vadd.f32 %v927_v11, %v2242_v13 }
 0x426   :  { %v874_v12 = vpop.f32.mrf.mxu0  ;;  %v1706_v14 = vpop.f32.mrf.mxu1 }
 0x427   :  { %1890 = vpow2.f32 %v1516_v10  ;;  %v1517_v16 = vmul.f32 -1.442695, %v929_v15 }
 0x429   :  { %1892 = vpow2.f32 %v1517_v16 }
 0x434   :  { %v1891_v17 = vpop.eup %1890 }
 0x435   :  { %v923_v18 = vadd.f32 1.0, %v1891_v17 }
 0x436   :  { %v1893_v19 = vpop.eup %1892 }
 0x437   :  { %1894 = vrcp.f32 %v923_v18  ;;  %v933_v21 = vadd.f32 1.0, %v1893_v19 }
 0x439   :  { %1896 = vrcp.f32 %v933_v21 }
 0x444   :  { %v1895_v24 = vpop.eup %1894 }
 0x445   :  { %v940_v25 = vmul.f32 %v1895_v24, %v938_v22 }
 0x446   :  { %v1897_v32 = vpop.eup %1896 }
 0x447   :  { %v941_v29 = vadd.f32 %v940_v25, %v2251_v55  ;;  %v943_v51 = vsub.f32 1.0, %v1897_v32  ;;  %v948_v59 = vmul.f32 %v1897_v32, %v946_v54 }
 0x449   :  { %1898 = vtanh.f32 %v941_v29 }
 0x456   :  { %v1899_v56 = vpop.eup %1898 }
 0x457   :  { %v944_v57 = vmul.f32 %v1899_v56, %v943_v51 }
 0x459   :  { %v2392_v62 = vadd.f32 %v948_v59, %v944_v57 }
 0x45b   :  { %v950_v63 = vpack.c.bf16 %v2392_v62, %v2392_v62  ;;  %v2398_v49 = vsel %vm1435_vm3, %v2350_v3, %v2392_v62  ;;  %v1067_v51 = vrot.slane %v2392_v62, 7 }
 0x45d   :  { %v952_v2 = vshrl.u32 %v950_v63, 16 }
 0x45f   :  { %v954_v61 = vrot.slane %v952_v2, 1 }
 0x461   :  { %989 = vmatmul.mubr.bf16.vlgmr.msra.gmra.mxu0 %v954_v61  ;;  %1724 = vmatmul.mubr.bf16.vlgmr.msra.gmra.mxu1 %v954_v61 }
 0x462   :  { %1076 = vmatpush1.bf16.msra.mxu0 %v2109_v26  ;;  %1728 = vmatpush3.bf16.msra.mxu1 %v2132_v35 }
 0x463   :  { %1077 = vmatprep.subr.bf16.mxu0 %v2111_v27  ;;  %1729 = vmatprep.subr.bf16.mxu1 %v2050_v0 }
 0x464   :  { %1107 = vmatprep.mubr.bf16.mxu0 %v2051_v1  ;;  %1743 = vmatprep.mubr.msk.bf16.mxu1 %vm2052_vm0, %v2050_v0 }
 0x466   :  { %1078 = vmatpush1.bf16.msra.mxu0 %v2118_v30  ;;  %1730 = vmatpush3.bf16.msra.mxu1 %v2142_v38 }
 0x467   :  { %1079 = vmatprep.subr.bf16.mxu0 %v2121_v31  ;;  %1731 = vmatprep.subr.bf16.mxu1 %v2050_v0 }
 0x46a   :  { %1080 = vmatpush1.bf16.msra.mxu0 %v2127_v33  ;;  %1732 = vmatpush3.bf16.msra.mxu1 %v2154_v41 }
 0x46b   :  { %1081 = vmatprep.subr.bf16.mxu0 %v2130_v34  ;;  %1733 = vmatprep.subr.bf16.mxu1 %v2050_v0 }
 0x46e   :  { %1082 = vmatpush1.bf16.msra.mxu0 %v2136_v36  ;;  %1734 = vmatpush3.bf16.msra.mxu1 %v2164_v44 }
 0x46f   :  { %1083 = vmatprep.subr.bf16.mxu0 %v2139_v37  ;;  %1735 = vmatprep.subr.bf16.mxu1 %v2050_v0 }
 0x472   :  { %1084 = vmatpush1.bf16.msra.mxu0 %v2148_v39  ;;  %1736 = vmatpush3.bf16.msra.mxu1 %v2174_v47 }
 0x473   :  { %1085 = vmatprep.subr.bf16.mxu0 %v2151_v40  ;;  %1737 = vmatprep.subr.bf16.mxu1 %v2050_v0 }
 0x476   :  { %1086 = vmatpush1.bf16.msra.mxu0 %v2158_v42  ;;  %1738 = vmatpush3.bf16.msra.mxu1 %v2184_v50 }
 0x477   :  { %1087 = vmatprep.subr.bf16.mxu0 %v2161_v43  ;;  %1739 = vmatprep.subr.bf16.mxu1 %v2050_v0 }
 0x47a   :  { %1088 = vmatpush1.bf16.msra.mxu0 %v2168_v45  ;;  %1740 = vmatpush3.bf16.msra.mxu1 %v2191_v52 }
 0x47b   :  { %1089 = vmatprep.subr.bf16.mxu0 %v2171_v46  ;;  %1741 = vmatprep.subr.bf16.mxu1 %v2050_v0 }
 0x47e   :  { %1090 = vmatpush1.bf16.msra.mxu0 %v2178_v48  ;;  %1742 = vmatpush3.bf16.msra.mxu1 %v2198_v53 }
 0x47f   :  { %1196 = vmatprep.subr.bf16.mxu0 %v2106_v23  ;;  %1747 = vmatprep.subr.bf16.mxu1 %v2050_v0 }
 0x521   :  { %v990_v60 = vpop.f32.mrf.mxu0  ;;  %v1031_v3 = vpop.f32.mrf.mxu1 }
 0x522   :  { %v1038_v58 = vrot.slane %v990_v60, 4  ;;  %v1057_v19 = vadd.f32 %v1031_v3, %v2248_v28 }
 0x523   :  { %v992_v4 = vpop.f32.mrf.mxu0  ;;  %v1725_v5 = vpop.f32.mrf.mxu1 }
 0x524   :  { %v1040_v7 = vadd.f32 %v1038_v58, %v2239_v6  ;;  %v1048_v11 = vrot.slane %v992_v4, 4  ;;  %v1059_v21 = vrot.slane %v1057_v19, 4  ;;  %v1943_v19 = vld [vmem:[#allocation8 + $0x94] ss:$12 sps:$4 sm:$0xff]  }
 0x525   :  { %v994_v8 = vpop.f32.mrf.mxu0  ;;  %v1034_v9 = vpop.f32.mrf.mxu1 }
 0x526   :  { %v1518_v10 = vmul.f32 -1.442695, %v1040_v7  ;;  %v1050_v15 = vadd.f32 %v1048_v11, %v2242_v13 }
 0x527   :  { %v995_v12 = vpop.f32.mrf.mxu0  ;;  %v1726_v14 = vpop.f32.mrf.mxu1 }
 0x528   :  { %1900 = vpow2.f32 %v1518_v10  ;;  %v1519_v16 = vmul.f32 -1.442695, %v1050_v15 }
 0x52a   :  { %1902 = vpow2.f32 %v1519_v16 }
 0x535   :  { %v1901_v23 = vpop.eup %1900 }
 0x536   :  { %v1044_v17 = vadd.f32 1.0, %v1901_v23 }
 0x537   :  { %v1903_v18 = vpop.eup %1902 }
 0x538   :  { %1904 = vrcp.f32 %v1044_v17  ;;  %v1054_v20 = vadd.f32 1.0, %v1903_v18  ;;  %v1941_v17 = vld [vmem:[#allocation8 + $0xa8] ss:$12 sps:$4 sm:$0xff]   ;;  %v1942_v18 = vld [vmem:[#allocation8 + $0xb0] ss:$12 sps:$4 sm:$0xff]  }
 0x53a   :  { %1906 = vrcp.f32 %v1054_v20  ;;  %v1944_v20 = vld [vmem:[#allocation8 + $0x90] ss:$12 sps:$4 sm:$0xff]  }
 0x545   :  { %v1905_v22 = vpop.eup %1904 }
 0x546   :  { %v1061_v24 = vmul.f32 %v1905_v22, %v1059_v21  ;;  %v1945_v21 = vld [vmem:[#allocation8 + $0x98] ss:$12 sps:$4 sm:$0xff]   ;;  %v1946_v22 = vld [vmem:[#allocation8 + $0x7c] ss:$12 sps:$4 sm:$0xff]  }
 0x547   :  { %v1907_v29 = vpop.eup %1906 }
 0x548   :  { %v1062_v25 = vadd.f32 %v1061_v24, %v2251_v55  ;;  %v1064_v32 = vsub.f32 1.0, %v1907_v29  ;;  %v1069_v57 = vmul.f32 %v1907_v29, %v1067_v51  ;;  %v1947_v24 = vld [vmem:[#allocation8 + $0x78] ss:$12 sps:$4 sm:$0xff]   ;;  %v1952_v51 = vld [vmem:[#allocation8 + $0x48] ss:$12 sps:$4 sm:$0xff]  }
 0x549   :  { %v1949_v29 = vld [vmem:[#allocation8 + $0x64] ss:$12 sps:$4 sm:$0xff]  }
 0x54a   :  { %1908 = vtanh.f32 %v1062_v25  ;;  %v1948_v25 = vld [vmem:[#allocation8 + $0x80] ss:$12 sps:$4 sm:$0xff]  }
 0x557   :  { %v1909_v54 = vpop.eup %1908 }
 0x558   :  { %v1065_v56 = vmul.f32 %v1909_v54, %v1064_v32  ;;  %v1951_v32 = vld [vmem:[#allocation8 + $0x4c] ss:$12 sps:$4 sm:$0xff]   ;;  %v1953_v54 = vld [vmem:[#allocation8 + $0x34] ss:$12 sps:$4 sm:$0xff]  }
 0x55a   :  { %v2440_v59 = vadd.f32 %v1069_v57, %v1065_v56  ;;  %v1954_v56 = vld [vmem:[#allocation8 + $0x30] ss:$12 sps:$4 sm:$0xff]  }
 0x55b   :  { %v1955_v57 = vld [vmem:[#allocation8 + $0x1c] ss:$12 sps:$4 sm:$0xff]  }
 0x55c   :  { %v1071_v63 = vpack.c.bf16 %v2440_v59, %v2440_v59  ;;  %v2446_v2 = vsel %vm1437_vm4, %v2398_v49, %v2440_v59  ;;  %v1186_v8 = vrot.slane %v2440_v59, 7  ;;  %v1957_v59 = vld [vmem:[#allocation8 + $0x4] ss:$12 sps:$4 sm:$0xff]  }
 0x55e   :  { %v1073_v61 = vrot.slane %v1071_v63, 2 }
 0x560   :  { %1108 = vmatmul.mubr.bf16.vlgmr.msra.gmra.mxu0 %v1073_v61  ;;  %1744 = vmatmul.mubr.bf16.vlgmr.msra.gmra.mxu1 %v1073_v61 }
 0x561   :  { %1197 = vmatpush1.bf16.msra.mxu0 %v2109_v26  ;;  %1748 = vmatpush3.bf16.msra.mxu1 %v2132_v35  ;;  %v1940_v26 = vld [vmem:[#allocation8 + $0xac] ss:$12 sps:$4 sm:$0xff]  }
 0x562   :  { %1198 = vmatprep.subr.bf16.mxu0 %v2111_v27  ;;  %1749 = vmatprep.subr.bf16.mxu1 %v2050_v0 }
 0x563   :  { %1228 = vmatprep.mubr.bf16.mxu0 %v2051_v1  ;;  %1763 = vmatprep.mubr.msk.bf16.mxu1 %vm2052_vm0, %v2050_v0 }
 0x565   :  { %1199 = vmatpush1.bf16.msra.mxu0 %v2118_v30  ;;  %1750 = vmatpush3.bf16.msra.mxu1 %v2142_v38 }
 0x566   :  { %1200 = vmatprep.subr.bf16.mxu0 %v2121_v31  ;;  %1751 = vmatprep.subr.bf16.mxu1 %v2050_v0 }
 0x569   :  { %1201 = vmatpush1.bf16.msra.mxu0 %v2127_v33  ;;  %1752 = vmatpush3.bf16.msra.mxu1 %v2154_v41 }
 0x56a   :  { %1202 = vmatprep.subr.bf16.mxu0 %v2130_v34  ;;  %1753 = vmatprep.subr.bf16.mxu1 %v2050_v0 }
 0x56d   :  { %1203 = vmatpush1.bf16.msra.mxu0 %v2136_v36  ;;  %1754 = vmatpush3.bf16.msra.mxu1 %v2164_v44 }
 0x56e   :  { %1204 = vmatprep.subr.bf16.mxu0 %v2139_v37  ;;  %1755 = vmatprep.subr.bf16.mxu1 %v2050_v0 }
 0x571   :  { %1205 = vmatpush1.bf16.msra.mxu0 %v2148_v39  ;;  %1756 = vmatpush3.bf16.msra.mxu1 %v2174_v47 }
 0x572   :  { %1206 = vmatprep.subr.bf16.mxu0 %v2151_v40  ;;  %1757 = vmatprep.subr.bf16.mxu1 %v2050_v0 }
 0x575   :  { %1207 = vmatpush1.bf16.msra.mxu0 %v2158_v42  ;;  %1758 = vmatpush3.bf16.msra.mxu1 %v2184_v50 }
 0x576   :  { %1208 = vmatprep.subr.bf16.mxu0 %v2161_v43  ;;  %1759 = vmatprep.subr.bf16.mxu1 %v2050_v0 }
 0x579   :  { %1209 = vmatpush1.bf16.msra.mxu0 %v2168_v45  ;;  %1760 = vmatpush3.bf16.msra.mxu1 %v2191_v52 }
 0x57a   :  { %1210 = vmatprep.subr.bf16.mxu0 %v2171_v46  ;;  %1761 = vmatprep.subr.bf16.mxu1 %v2050_v0 }
 0x57d   :  { %1211 = vmatpush1.bf16.msra.mxu0 %v2178_v48  ;;  %1762 = vmatpush3.bf16.msra.mxu1 %v2198_v53 }
 0x57e   :  { %1315 = vmatprep.subr.bf16.mxu0 %v1940_v26  ;;  %1767 = vmatprep.subr.bf16.mxu1 %v2050_v0 }
 0x620   :  { %v1109_v27 = vpop.f32.mrf.mxu0  ;;  %v1150_v30 = vpop.f32.mrf.mxu1 }
 0x621   :  { %v1157_v31 = vrot.slane %v1109_v27, 3  ;;  %v1176_v62 = vadd.f32 %v1150_v30, %v2248_v28 }
 0x622   :  { %v1111_v33 = vpop.f32.mrf.mxu0  ;;  %v1745_v34 = vpop.f32.mrf.mxu1 }
 0x623   :  { %v1159_v35 = vadd.f32 %v1157_v31, %v2239_v6  ;;  %v1167_v39 = vrot.slane %v1111_v33, 3  ;;  %v1178_v60 = vrot.slane %v1176_v62, 3 }
 0x624   :  { %v1113_v36 = vpop.f32.mrf.mxu0  ;;  %v1153_v37 = vpop.f32.mrf.mxu1 }
 0x625   :  { %v1520_v38 = vmul.f32 -1.442695, %v1159_v35  ;;  %v1169_v42 = vadd.f32 %v1167_v39, %v2242_v13 }
 0x626   :  { %v1114_v40 = vpop.f32.mrf.mxu0  ;;  %v1746_v41 = vpop.f32.mrf.mxu1 }
 0x627   :  { %1910 = vpow2.f32 %v1520_v38  ;;  %v1521_v43 = vmul.f32 -1.442695, %v1169_v42 }
 0x629   :  { %1912 = vpow2.f32 %v1521_v43 }
 0x634   :  { %v1911_v45 = vpop.eup %1910 }
 0x635   :  { %v1163_v46 = vadd.f32 1.0, %v1911_v45 }
 0x636   :  { %v1913_v48 = vpop.eup %1912 }
 0x637   :  { %1914 = vrcp.f32 %v1163_v46  ;;  %v1173_v49 = vadd.f32 1.0, %v1913_v48 }
 0x639   :  { %1916 = vrcp.f32 %v1173_v49 }
 0x644   :  { %v1915_v3 = vpop.eup %1914 }
 0x645   :  { %v1180_v58 = vmul.f32 %v1915_v3, %v1178_v60 }
 0x646   :  { %v1917_v5 = vpop.eup %1916 }
 0x647   :  { %v1181_v4 = vadd.f32 %v1180_v58, %v2251_v55  ;;  %v1183_v7 = vsub.f32 1.0, %v1917_v5  ;;  %v1188_v11 = vmul.f32 %v1917_v5, %v1186_v8 }
 0x649   :  { %1918 = vtanh.f32 %v1181_v4 }
 0x656   :  { %v1919_v9 = vpop.eup %1918 }
 0x657   :  { %v1184_v10 = vmul.f32 %v1919_v9, %v1183_v7 }
 0x659   :  { %v2487_v12 = vadd.f32 %v1188_v11, %v1184_v10 }
 0x65b   :  { %v1190_v14 = vpack.c.bf16 %v2487_v12, %v2487_v12  ;;  %v2493_v15 = vsel %vm1439_vm5, %v2446_v2, %v2487_v12  ;;  %v1307_v62 = vrot.slane %v2487_v12, 7 }
 0x65d   :  { %v1192_v16 = vshrl.u32 %v1190_v14, 16 }
 0x65f   :  { %v1194_v23 = vrot.slane %v1192_v16, 2 }
 0x661   :  { %1229 = vmatmul.mubr.bf16.vlgmr.msra.gmra.mxu0 %v1194_v23  ;;  %1764 = vmatmul.mubr.bf16.vlgmr.msra.gmra.mxu1 %v1194_v23 }
 0x662   :  { %1316 = vmatpush1.bf16.msra.mxu0 %v1941_v17  ;;  %1768 = vmatpush3.bf16.msra.mxu1 %v1942_v18 }
 0x663   :  { %1317 = vmatprep.subr.bf16.mxu0 %v1943_v19  ;;  %1769 = vmatprep.subr.bf16.mxu1 %v2050_v0 }
 0x664   :  { %1347 = vmatprep.mubr.bf16.mxu0 %v2051_v1  ;;  %1783 = vmatprep.mubr.msk.bf16.mxu1 %vm2052_vm0, %v2050_v0  ;;  %v1950_v1 = vld [vmem:[#allocation8 + $0x60] ss:$12 sps:$4 sm:$0xff]  }
 0x666   :  { %1318 = vmatpush1.bf16.msra.mxu0 %v1944_v20  ;;  %1770 = vmatpush3.bf16.msra.mxu1 %v1945_v21 }
 0x667   :  { %1319 = vmatprep.subr.bf16.mxu0 %v1946_v22  ;;  %1771 = vmatprep.subr.bf16.mxu1 %v2050_v0 }
 0x66a   :  { %1320 = vmatpush1.bf16.msra.mxu0 %v1947_v24  ;;  %1772 = vmatpush3.bf16.msra.mxu1 %v1948_v25 }
 0x66b   :  { %1321 = vmatprep.subr.bf16.mxu0 %v1949_v29  ;;  %1773 = vmatprep.subr.bf16.mxu1 %v2050_v0 }
 0x66e   :  { %1322 = vmatpush1.bf16.msra.mxu0 %v1950_v1  ;;  %1774 = vmatpush3.bf16.msra.mxu1 %v2164_v44  ;;  %v1956_v44 = vld [vmem:[#allocation8 + $0x18] ss:$12 sps:$4 sm:$0xff]  }
 0x66f   :  { %1323 = vmatprep.subr.bf16.mxu0 %v1951_v32  ;;  %1775 = vmatprep.subr.bf16.mxu1 %v2050_v0 }
 0x672   :  { %1324 = vmatpush1.bf16.msra.mxu0 %v1952_v51  ;;  %1776 = vmatpush3.bf16.msra.mxu1 %v2174_v47  ;;  %v1958_v47 = vld [vmem:[#allocation8] ss:$12 sps:$4 sm:$0xff]  }
 0x673   :  { %1325 = vmatprep.subr.bf16.mxu0 %v1953_v54  ;;  %1777 = vmatprep.subr.bf16.mxu1 %v2050_v0 }
 0x676   :  { %1326 = vmatpush1.bf16.msra.mxu0 %v1954_v56  ;;  %1778 = vmatpush3.bf16.msra.mxu1 %v2184_v50 }
 0x677   :  { %1327 = vmatprep.subr.bf16.mxu0 %v1955_v57  ;;  %1779 = vmatprep.subr.bf16.mxu1 %v2050_v0 }
 0x67a   :  { %1328 = vmatpush1.bf16.msra.mxu0 %v1956_v44  ;;  %1780 = vmatpush3.bf16.msra.mxu1 %v2191_v52 }
 0x67b   :  { %1329 = vmatprep.subr.bf16.mxu0 %v1957_v59  ;;  %1781 = vmatprep.subr.bf16.mxu1 %v2050_v0 }
 0x67e   :  { %1330 = vmatpush1.bf16.msra.mxu0 %v1958_v47  ;;  %1782 = vmatpush3.bf16.msra.mxu1 %v2198_v53 }
 0x721   :  { %v1230_v63 = vpop.f32.mrf.mxu0  ;;  %v1271_v2 = vpop.f32.mrf.mxu1 }
 0x722   :  { %v1278_v61 = vrot.slane %v1230_v63, 2  ;;  %v1297_v39 = vadd.f32 %v1271_v2, %v2248_v28 }
 0x723   :  { %v1232_v50 = vpop.f32.mrf.mxu0  ;;  %v1765_v26 = vpop.f32.mrf.mxu1 }
 0x724   :  { %v1280_v27 = vadd.f32 %v1278_v61, %v2239_v6  ;;  %v1288_v34 = vrot.slane %v1232_v50, 2  ;;  %v1299_v41 = vrot.slane %v1297_v39, 2 }
 0x725   :  { %v1234_v30 = vpop.f32.mrf.mxu0  ;;  %v1274_v31 = vpop.f32.mrf.mxu1 }
 0x726   :  { %v1522_v33 = vmul.f32 -1.442695, %v1280_v27  ;;  %v1290_v0 = vadd.f32 %v1288_v34, %v2242_v13 }
 0x727   :  { %v1235_v52 = vpop.f32.mrf.mxu0  ;;  %v1766_v35 = vpop.f32.mrf.mxu1 }
 0x728   :  { %1920 = vpow2.f32 %v1522_v33  ;;  %v1523_v36 = vmul.f32 -1.442695, %v1290_v0 }
 0x72a   :  { %1922 = vpow2.f32 %v1523_v36 }
 0x735   :  { %v1921_v37 = vpop.eup %1920 }
 0x736   :  { %v1284_v53 = vadd.f32 1.0, %v1921_v37 }
 0x737   :  { %v1923_v38 = vpop.eup %1922 }
 0x738   :  { %1924 = vrcp.f32 %v1284_v53  ;;  %v1294_v40 = vadd.f32 1.0, %v1923_v38 }
 0x73a   :  { %1926 = vrcp.f32 %v1294_v40 }
 0x745   :  { %v1925_v42 = vpop.eup %1924 }
 0x746   :  { %v1301_v43 = vmul.f32 %v1925_v42, %v1299_v41 }
 0x747   :  { %v1927_v46 = vpop.eup %1926 }
 0x748   :  { %v1302_v45 = vadd.f32 %v1301_v43, %v2251_v55  ;;  %v1304_v48 = vsub.f32 1.0, %v1927_v46  ;;  %v1309_v3 = vmul.f32 %v1927_v46, %v1307_v62 }
 0x74a   :  { %1928 = vtanh.f32 %v1302_v45 }
 0x757   :  { %v1929_v49 = vpop.eup %1928 }
 0x758   :  { %v1305_v60 = vmul.f32 %v1929_v49, %v1304_v48 }
 0x75a   :  { %v1310_v58 = vadd.f32 %v1309_v3, %v1305_v60 }
 0x75c   :  { %v1311_v4 = vpack.c.bf16 %v1310_v58, %v1310_v58  ;;  %v1442_v5 = vsel %vm1441_vm6, %v2493_v15, %v1310_v58  ;;  %v1426_v44 = vrot.slane %v1310_v58, 7 }
 0x75e   :  { %v1313_v7 = vrot.slane %v1311_v4, 3 }
 0x760   :  { %1348 = vmatmul.mubr.bf16.vlgmr.msra.gmra.mxu0 %v1313_v7  ;;  %1784 = vmatmul.mubr.bf16.vlgmr.msra.gmra.mxu1 %v1313_v7 }
 0x820   :  { %v1349_v8 = vpop.f32.mrf.mxu0  ;;  %v1390_v9 = vpop.f32.mrf.mxu1 }
 0x821   :  { %v1397_v10 = vrot.slane %v1349_v8, 1  ;;  %v1416_v29 = vadd.f32 %v1390_v9, %v2248_v28 }
 0x822   :  { %v1351_v11 = vpop.f32.mrf.mxu0  ;;  %v1785_v14 = vpop.f32.mrf.mxu1 }
 0x823   :  { %v1399_v16 = vadd.f32 %v1397_v10, %v2239_v6  ;;  %v1407_v18 = vrot.slane %v1351_v11, 1  ;;  %v1418_v32 = vrot.slane %v1416_v29, 1 }
 0x824   :  { %v1353_v23 = vpop.f32.mrf.mxu0  ;;  %v1393_v12 = vpop.f32.mrf.mxu1 }
 0x825   :  { %v1524_v17 = vmul.f32 -1.442695, %v1399_v16  ;;  %v1409_v21 = vadd.f32 %v1407_v18, %v2242_v13 }
 0x826   :  { %v1354_v19 = vpop.f32.mrf.mxu0  ;;  %v1786_v20 = vpop.f32.mrf.mxu1 }
 0x827   :  { %1930 = vpow2.f32 %v1524_v17  ;;  %v1525_v15 = vmul.f32 -1.442695, %v1409_v21 }
 0x829   :  { %1932 = vpow2.f32 %v1525_v15 }
 0x834   :  { %v1931_v22 = vpop.eup %1930 }
 0x835   :  { %v1403_v24 = vadd.f32 1.0, %v1931_v22 }
 0x836   :  { %v1933_v25 = vpop.eup %1932 }
 0x837   :  { %1934 = vrcp.f32 %v1403_v24  ;;  %v1413_v1 = vadd.f32 1.0, %v1933_v25 }
 0x839   :  { %1936 = vrcp.f32 %v1413_v1 }
 0x844   :  { %v1935_v6 = vpop.eup %1934 }
 0x845   :  { %v1420_v51 = vmul.f32 %v1935_v6, %v1418_v32 }
 0x846   :  { %v1937_v56 = vpop.eup %1936 }
 0x847   :  { %v1421_v54 = vadd.f32 %v1420_v51, %v2251_v55  ;;  %v1423_v57 = vsub.f32 1.0, %v1937_v56  ;;  %v1428_v47 = vmul.f32 %v1937_v56, %v1426_v44 }
 0x849   :  { %1938 = vtanh.f32 %v1421_v54 }
 0x856   :  { %v1939_v13 = vpop.eup %1938 }
 0x857   :  { %v1424_v59 = vmul.f32 %v1939_v13, %v1423_v57 }
 0x859   :  { %v1429_v63 = vadd.f32 %v1428_v47, %v1424_v59 }
 0x85b   :  { %1430 = vst [vmem:[#allocation2 - $0x7] sm:$0x80] %v1429_v63  ;;  %v1444_v28 = vsel %vm1443_vm7, %v1442_v5, %v1429_v63 }
 0x85c   :  { %1445 = vst [vmem:[#allocation9] sm:$0xff] %v1444_v28 }
 0x85d   :  { %2030 = shalt.err (!%p2027_p5)
}
 0x85e   :  { %1455 = dma.vmem_to_hbm [thread:$0]  %s1453_s15, 128, %s2529_s6, [#allocation5]  }
 0x85f   :  { %2043 = dma.done.wait [#allocation5], 128  }
 0x860   :  { %2044 = vsyncadd [#allocation5], 4294967168 }
 0x861   :  { %1459 = vsyncpa [#allocation4], 1 }
 0x862   :  { %1460 = vsyncpa [#allocation7], 1 }
 0x863   :  { %1461 = vsyncpa [#allocation5], 1 }

</bundles_post_ra>
